<compile_context>
chip_gen: v5e
topology: v5e:2x2
jax: 0.10.0
libtpu: 0.0.40
codegen_flags: <defaults>
</compile_context>

<pallas_src>
import functools

import numpy as np
import jax
import jax.numpy as jnp
from jax.experimental import pallas as pl
from jax.experimental.pallas import tpu as pltpu

_SELU_ALPHA = 1.6732632423543772
_SELU_SCALE = 1.0507009873554805


# ----------------------------------------------------------------------------
# Pallas kernel: one batch block (Bb, N, D_in) -> (Bb, N, D_pad) per grid step
# ----------------------------------------------------------------------------
def _gat_kernel(x_ref, watt_ref, batt_ref, aw_ref, wwa_ref, wwo_ref, bias_ref, o_ref):
    x = x_ref[...]                                   # (Bb, N, D_in) f32
    bb, n, d_in = x.shape
    d_pad = watt_ref.shape[1]

    # Pairwise node products: pm[b, i, j, :] = x[b, i, :] * x[b, j, :]
    # (queries i lead, keys j are the softmax axis). Flattened to one lane-dense
    # (Bb*N*N, D_in) slab for a single MXU matmul.
    pm = (x[:, :, None, :] * x[:, None, :, :]).reshape(bb * n * n, d_in)

    # att_proj + tanh: bf16 MXU operands, f32 accumulation, f32 activation math.
    h = jnp.dot(pm.astype(jnp.bfloat16), watt_ref[...],
                preferred_element_type=jnp.float32) + batt_ref[...]
    h = jnp.tanh(h).reshape(bb * n, n, d_pad)        # (Bb*N, N, D_pad)

    # Attention logits e[q, j] = sum_k h[q, j, k] * aw[k]  (aw already holds 1/temp;
    # padded columns of aw are zero, so the out-dim padding contributes nothing).
    e = jnp.sum(h * aw_ref[...], axis=-1)            # (Bb*N, N)  keys on lanes

    # Softmax over the key axis j (torch softmax dim=-2 of the (B,N,N,1) map),
    # lane-dense, f32 math.  NOTE: this is genuinely the key axis, so it stays
    # correct even if the score ever becomes asymmetric.
    e = e - jnp.max(e, axis=-1, keepdims=True)
    p = jnp.exp(e)
    p = p * pl.reciprocal(jnp.sum(p, axis=-1, keepdims=True), approx=True)

    # Attention-weighted aggregation on the MXU: agg[b, i, :] = sum_j p[b,i,j]*x[b,j,:]
    agg = jnp.einsum('bij,bjd->bid',
                     p.reshape(bb, n, n).astype(jnp.bfloat16),
                     x.astype(jnp.bfloat16),
                     preferred_element_type=jnp.float32)          # (Bb, N, D_in)

    # proj_with_att + proj_without_att with BatchNorm (inference) folded into the
    # weights/bias, then SELU.
    y = (jnp.dot(agg.reshape(bb * n, d_in).astype(jnp.bfloat16), wwa_ref[...],
                 preferred_element_type=jnp.float32)
         + jnp.dot(x.reshape(bb * n, d_in).astype(jnp.bfloat16), wwo_ref[...],
                   preferred_element_type=jnp.float32)
         + bias_ref[...])
    y = _SELU_SCALE * jnp.where(
        y > 0.0, y, _SELU_ALPHA * (jnp.exp(jnp.minimum(y, 0.0)) - 1.0))

    o_ref[...] = y.reshape(bb, n, d_pad).astype(o_ref.dtype)      # lane-dense store


# ----------------------------------------------------------------------------
# Wrapper: grid/block selection + pallas_call
# ----------------------------------------------------------------------------
def _pick_batch_block(b, n, d_in, d_pad, requested=None):
    """Fat batch blocks, but keep >=2 grid steps (v7x megacore) and bound VMEM."""
    if requested is not None:
        bb = int(requested)
    else:
        # Conservative budget that also holds on v7x (64 MiB physical VMEM):
        # pm (f32 + bf16) + h (f32) slabs + in/out blocks per batch element.
        budget = 24 * 1024 * 1024
        per_batch = n * n * (d_in * 6 + d_pad * 4) + 2 * n * (d_in + d_pad) * 4
        bb_cap = max(1, budget // max(per_batch, 1))
        bb = 1
        for cand in range(min(b, bb_cap), 0, -1):
            if b % cand != 0:
                continue
            if b // cand >= 2 or b < 2:          # keep >= 2 parallel grid steps
                bb = cand
                break
    assert b % bb == 0, "batch block must divide the batch size"
    return bb


def _pallas_forward(x, watt, batt, aw, wwa, wwo, bias, *, out_dim, batch_block=None):
    b, n, d_in = x.shape
    d_pad = watt.shape[1]
    bb = _pick_batch_block(b, n, d_in, d_pad, batch_block)

    const = lambda shape: pl.BlockSpec(shape, lambda bi: (0, 0))
    out = pl.pallas_call(
        _gat_kernel,
        out_shape=jax.ShapeDtypeStruct((b, n, d_pad), jnp.float32),
        grid=(b // bb,),
        in_specs=[
            pl.BlockSpec((bb, n, d_in), lambda bi: (bi, 0, 0)),   # x (keys == queries)
            const((d_in, d_pad)),      # att_proj weight (transposed, bf16, padded)
            const((1, d_pad)),         # att_proj bias (f32, padded)
            const((1, d_pad)),         # att_weight / temp (f32, padded)
            const((d_in, d_pad)),      # proj_with_att weight (BN scale folded, bf16)
            const((d_in, d_pad)),      # proj_without_att weight (BN scale folded, bf16)
            const((1, d_pad)),         # fused bias (proj biases + BN shift, f32)
        ],
        out_specs=pl.BlockSpec((bb, n, d_pad), lambda bi: (bi, 0, 0)),
        compiler_params=pltpu.CompilerParams(
            dimension_semantics=("parallel",),
            # Generous but v7x-safe cap; raise toward ~100 MiB on v5e/v6e for large N.
            vmem_limit_bytes=64 * 1024 * 1024),
    )(x, watt, batt, aw, wwa, wwo, bias)

    if d_pad != out_dim:
        out = out[..., :out_dim]
    return out


# ----------------------------------------------------------------------------
# Module wrapper (deterministic in-script parameters; no checkpoint loading)
# ----------------------------------------------------------------------------
class GraphAttentionLayerPallas:
    def __init__(self, in_dim, out_dim, key, temperature=1.0, batch_block=None, eps=1e-5):
        self.in_dim, self.out_dim = in_dim, out_dim
        self.temp = float(temperature)
        self.eps = float(eps)

        ks = jax.random.split(key, 8)

        def linear(k, fan_in, fan_out):
            # mirrors torch.nn.Linear default init; weight stored transposed (in, out)
            bound = 1.0 / np.sqrt(fan_in)
            kw, kb = jax.random.split(k)
            w = jax.random.uniform(kw, (fan_in, fan_out), jnp.float32, -bound, bound)
            bb = jax.random.uniform(kb, (1, fan_out), jnp.float32, -bound, bound)
            return w, bb

        # Original (unfolded, f32) parameters — also used by the pure-JAX reference.
        self.att_w, self.att_b = linear(ks[0], in_dim, out_dim)          # att_proj
        std = float(np.sqrt(2.0 / (out_dim + 1)))                        # xavier_normal_
        self.att_weight = std * jax.random.normal(ks[1], (out_dim, 1), jnp.float32)
        self.wwa, self.bwa = linear(ks[2], in_dim, out_dim)              # proj_with_att
        self.wwo, self.bwo = linear(ks[3], in_dim, out_dim)              # proj_without_att

        # BatchNorm1d(out_dim) parameters / running stats (inference mode).
        # TODO(synk): training-mode batch statistics and Dropout(p=0.2) are not
        # implemented; forward matches the module in eval() mode.
        self.bn_gamma = 1.0 + 0.1 * jax.random.normal(ks[4], (1, out_dim), jnp.float32)
        self.bn_beta = 0.1 * jax.random.normal(ks[5], (1, out_dim), jnp.float32)
        self.bn_mean = 0.1 * jax.random.normal(ks[6], (1, out_dim), jnp.float32)
        self.bn_var = 1.0 + 0.1 * jnp.abs(jax.random.normal(ks[7], (1, out_dim), jnp.float32))

        # --- one-time inference folds (scale-once) + lane-dense padding + bf16 ---
        d_pad = -(-out_dim // 128) * 128     # round out_dim up to a multiple of 128
        self.d_pad = d_pad

        def pad_cols(a):
            d = a.shape[-1]
            return a if d == d_pad else jnp.pad(a, ((0, 0), (0, d_pad - d)))

        bn_scale = self.bn_gamma / jnp.sqrt(self.bn_var + self.eps)
        bn_shift = self.bn_beta - self.bn_mean * bn_scale

        self._watt_k = pad_cols(self.att_w).astype(jnp.bfloat16)
        self._batt_k = pad_cols(self.att_b)                                     # f32
        self._aw_k = pad_cols((self.att_weight / self.temp).reshape(1, out_dim))  # f32
        self._wwa_k = pad_cols(self.wwa * bn_scale).astype(jnp.bfloat16)
        self._wwo_k = pad_cols(self.wwo * bn_scale).astype(jnp.bfloat16)
        self._bias_k = pad_cols((self.bwa + self.bwo) * bn_scale + bn_shift)    # f32

        self._forward = jax.jit(functools.partial(
            _pallas_forward, out_dim=out_dim, batch_block=batch_block))

    def __call__(self, x):
        return self._forward(x, self._watt_k, self._batt_k, self._aw_k,
                             self._wwa_k, self._wwo_k, self._bias_k)


# ----------------------------------------------------------------------------
# Pure-JAX reference (unfolded f32 parameters) for correctness checking
# ----------------------------------------------------------------------------
def reference_forward(layer, x):
    pm = x[:, :, None, :] * x[:, None, :, :]                      # (B, N, N, D_in)
    h = jnp.tanh(pm @ layer.att_w + layer.att_b)                  # (B, N, N, D_out)
    e = (h @ layer.att_weight)[..., 0] / layer.temp               # (B, N, N)
    p = jax.nn.softmax(e, axis=-1)                                # softmax over keys j
    agg = jnp.einsum('bij,bjd->bid', p, x)
    y = agg @ layer.wwa + layer.bwa + x @ layer.wwo + layer.bwo
    y = (y - layer.bn_mean) / jnp.sqrt(layer.bn_var + layer.eps) * layer.bn_gamma + layer.bn_beta
    return _SELU_SCALE * jnp.where(
        y > 0.0, y, _SELU_ALPHA * (jnp.exp(jnp.minimum(y, 0.0)) - 1.0))


# ----------------------------------------------------------------------------
# Main
# ----------------------------------------------------------------------------
if __name__ == "__main__":
    B, N, IN_DIM, OUT_DIM = 2, 16, 32, 64

    key = jax.random.PRNGKey(0)
    kx, kp = jax.random.split(key)
    x = jax.random.normal(kx, (B, N, IN_DIM), dtype=jnp.float32)

    layer = GraphAttentionLayerPallas(IN_DIM, OUT_DIM, kp, temperature=2.0)

    out = jax.block_until_ready(layer(x))

    assert out.shape == (B, N, OUT_DIM), out.shape
    assert bool(jnp.all(jnp.isfinite(out)))

    ref = jax.block_until_ready(reference_forward(layer, x))
    # bf16 MXU operands + approx reciprocal -> compare at 2e-2.
    np.testing.assert_allclose(np.asarray(out), np.asarray(ref), rtol=2e-2, atol=2e-2)

    print("KERNEL_OK")
</pallas_src>

<mosaic_0001>
module attributes {stable_mosaic.version = 11 : i64} {
  func.func @_gat_kernel(%arg0: i32, %arg1: memref<1x16x32xf32, #tpu.memory_space<vmem>>, %arg2: memref<32x128xbf16, #tpu.memory_space<vmem>>, %arg3: memref<1x128xf32, #tpu.memory_space<vmem>>, %arg4: memref<1x128xf32, #tpu.memory_space<vmem>>, %arg5: memref<32x128xbf16, #tpu.memory_space<vmem>>, %arg6: memref<32x128xbf16, #tpu.memory_space<vmem>>, %arg7: memref<1x128xf32, #tpu.memory_space<vmem>>, %arg8: memref<1x16x128xf32, #tpu.memory_space<vmem>>) attributes {dimension_semantics = [#tpu.dimension_semantics<parallel>], iteration_bounds = array<i64: 2>, scalar_prefetch = 0 : i64, scratch_operands = 0 : i64, tpu.core_type = #tpu.core_type<tc>, window_params = [{transform_indices = @transform_0, window_bounds = array<i64: 1, 16, 32>}, {pipeline_mode = #tpu.pipeline_mode<synchronous>, transform_indices = @transform_1, window_bounds = array<i64: 32, 128>}, {pipeline_mode = #tpu.pipeline_mode<synchronous>, transform_indices = @transform_2, window_bounds = array<i64: 1, 128>}, {pipeline_mode = #tpu.pipeline_mode<synchronous>, transform_indices = @transform_3, window_bounds = array<i64: 1, 128>}, {pipeline_mode = #tpu.pipeline_mode<synchronous>, transform_indices = @transform_4, window_bounds = array<i64: 32, 128>}, {pipeline_mode = #tpu.pipeline_mode<synchronous>, transform_indices = @transform_5, window_bounds = array<i64: 32, 128>}, {pipeline_mode = #tpu.pipeline_mode<synchronous>, transform_indices = @transform_6, window_bounds = array<i64: 1, 128>}, {transform_indices = @transform_7, window_bounds = array<i64: 1, 16, 128>}]} {
    %c0 = arith.constant 0 : index
    %c0_0 = arith.constant 0 : index
    %c0_1 = arith.constant 0 : index
    %0 = vector.load %arg1[%c0, %c0_0, %c0_1] : memref<1x16x32xf32, #tpu.memory_space<vmem>>, vector<1x16x32xf32>
    %1 = vector.shape_cast %0 : vector<1x16x32xf32> to vector<1x16x1x32xf32>
    %2 = vector.shape_cast %0 : vector<1x16x32xf32> to vector<1x1x16x32xf32>
    %3 = vector.broadcast %1 : vector<1x16x1x32xf32> to vector<1x16x16x32xf32>
    %4 = vector.broadcast %2 : vector<1x1x16x32xf32> to vector<1x16x16x32xf32>
    %5 = arith.mulf %3, %4 : vector<1x16x16x32xf32>
    %6 = vector.shape_cast %5 : vector<1x16x16x32xf32> to vector<256x32xf32>
    %7 = arith.truncf %6 : vector<256x32xf32> to vector<256x32xbf16>
    %c0_2 = arith.constant 0 : index
    %c0_3 = arith.constant 0 : index
    %8 = vector.load %arg2[%c0_2, %c0_3] : memref<32x128xbf16, #tpu.memory_space<vmem>>, vector<32x128xbf16>
    %cst = arith.constant dense<0.000000e+00> : vector<256x128xf32>
    %9 = tpu.matmul %7, %8, %cst {dimension_numbers = #tpu.dot_dimension_numbers<[1], [0], [0], [1], [0, 0, 1, 1], [], []>} : vector<256x32xbf16>, vector<32x128xbf16>, vector<256x128xf32> -> vector<256x128xf32>
    %c0_4 = arith.constant 0 : index
    %c0_5 = arith.constant 0 : index
    %10 = vector.load %arg3[%c0_4, %c0_5] : memref<1x128xf32, #tpu.memory_space<vmem>>, vector<1x128xf32>
    %11 = vector.broadcast %10 : vector<1x128xf32> to vector<256x128xf32>
    %12 = arith.addf %9, %11 : vector<256x128xf32>
    %13 = math.tanh %12 : vector<256x128xf32>
    %14 = vector.shape_cast %13 : vector<256x128xf32> to vector<16x16x128xf32>
    %c0_6 = arith.constant 0 : index
    %c0_7 = arith.constant 0 : index
    %15 = vector.load %arg4[%c0_6, %c0_7] : memref<1x128xf32, #tpu.memory_space<vmem>>, vector<1x128xf32>
    %16 = vector.shape_cast %15 : vector<1x128xf32> to vector<1x1x128xf32>
    %17 = vector.broadcast %16 : vector<1x1x128xf32> to vector<16x16x128xf32>
    %18 = arith.mulf %14, %17 : vector<16x16x128xf32>
    %cst_8 = arith.constant dense<0.000000e+00> : vector<16x16xf32>
    %19 = vector.multi_reduction <add>, %18, %cst_8 [2] : vector<16x16x128xf32> to vector<16x16xf32>
    %cst_9 = arith.constant dense<0xFF800000> : vector<16xf32>
    %20 = vector.multi_reduction <maximumf>, %19, %cst_9 [1] : vector<16x16xf32> to vector<16xf32>
    %21 = vector.shape_cast %20 : vector<16xf32> to vector<16x1xf32>
    %22 = vector.broadcast %21 : vector<16x1xf32> to vector<16x16xf32>
    %23 = arith.subf %19, %22 : vector<16x16xf32>
    %24 = math.exp %23 : vector<16x16xf32>
    %cst_10 = arith.constant dense<0.000000e+00> : vector<16xf32>
    %25 = vector.multi_reduction <add>, %24, %cst_10 [1] : vector<16x16xf32> to vector<16xf32>
    %26 = vector.shape_cast %25 : vector<16xf32> to vector<16x1xf32>
    %27 = tpu.reciprocal %26 {approx = true} : vector<16x1xf32> -> vector<16x1xf32>
    %28 = vector.broadcast %27 : vector<16x1xf32> to vector<16x16xf32>
    %29 = arith.mulf %24, %28 : vector<16x16xf32>
    %30 = vector.shape_cast %29 : vector<16x16xf32> to vector<1x16x16xf32>
    %31 = arith.truncf %30 : vector<1x16x16xf32> to vector<1x16x16xbf16>
    %32 = arith.truncf %0 : vector<1x16x32xf32> to vector<1x16x32xbf16>
    "tpu.trace_start"() <{level = 10 : i32, message = "bij,bjd->bid"}> : () -> ()
    %cst_11 = arith.constant dense<0.000000e+00> : vector<1x16x32xf32>
    %33 = tpu.matmul %31, %32, %cst_11 {dimension_numbers = #tpu.dot_dimension_numbers<[2], [1], [1], [2], [0, 0, 0, 1, 1, 2], [0], [0]>} : vector<1x16x16xbf16>, vector<1x16x32xbf16>, vector<1x16x32xf32> -> vector<1x16x32xf32>
    "tpu.trace_stop"() : () -> ()
    %34 = vector.shape_cast %33 : vector<1x16x32xf32> to vector<16x32xf32>
    %35 = arith.truncf %34 : vector<16x32xf32> to vector<16x32xbf16>
    %c0_12 = arith.constant 0 : index
    %c0_13 = arith.constant 0 : index
    %36 = vector.load %arg5[%c0_12, %c0_13] : memref<32x128xbf16, #tpu.memory_space<vmem>>, vector<32x128xbf16>
    %cst_14 = arith.constant dense<0.000000e+00> : vector<16x128xf32>
    %37 = tpu.matmul %35, %36, %cst_14 {dimension_numbers = #tpu.dot_dimension_numbers<[1], [0], [0], [1], [0, 0, 1, 1], [], []>} : vector<16x32xbf16>, vector<32x128xbf16>, vector<16x128xf32> -> vector<16x128xf32>
    %38 = vector.shape_cast %0 : vector<1x16x32xf32> to vector<16x32xf32>
    %39 = arith.truncf %38 : vector<16x32xf32> to vector<16x32xbf16>
    %c0_15 = arith.constant 0 : index
    %c0_16 = arith.constant 0 : index
    %40 = vector.load %arg6[%c0_15, %c0_16] : memref<32x128xbf16, #tpu.memory_space<vmem>>, vector<32x128xbf16>
    %cst_17 = arith.constant dense<0.000000e+00> : vector<16x128xf32>
    %41 = tpu.matmul %39, %40, %cst_17 {dimension_numbers = #tpu.dot_dimension_numbers<[1], [0], [0], [1], [0, 0, 1, 1], [], []>} : vector<16x32xbf16>, vector<32x128xbf16>, vector<16x128xf32> -> vector<16x128xf32>
    %42 = arith.addf %37, %41 : vector<16x128xf32>
    %c0_18 = arith.constant 0 : index
    %c0_19 = arith.constant 0 : index
    %43 = vector.load %arg7[%c0_18, %c0_19] : memref<1x128xf32, #tpu.memory_space<vmem>>, vector<1x128xf32>
    %44 = vector.broadcast %43 : vector<1x128xf32> to vector<16x128xf32>
    %45 = arith.addf %42, %44 : vector<16x128xf32>
    %cst_20 = arith.constant 0.000000e+00 : f32
    %46 = vector.broadcast %cst_20 : f32 to vector<16x128xf32>
    %47 = arith.cmpf ogt, %45, %46 : vector<16x128xf32>
    %cst_21 = arith.constant 0.000000e+00 : f32
    %48 = vector.broadcast %cst_21 : f32 to vector<16x128xf32>
    %49 = arith.minimumf %45, %48 : vector<16x128xf32>
    %50 = math.exp %49 : vector<16x128xf32>
    %cst_22 = arith.constant 1.000000e+00 : f32
    %51 = vector.broadcast %cst_22 : f32 to vector<16x128xf32>
    %52 = arith.subf %50, %51 : vector<16x128xf32>
    %cst_23 = arith.constant 1.67326319 : f32
    %53 = vector.broadcast %cst_23 : f32 to vector<16x128xf32>
    %54 = arith.mulf %53, %52 : vector<16x128xf32>
    %55 = arith.select %47, %45, %54 : vector<16x128xi1>, vector<16x128xf32>
    %cst_24 = arith.constant 1.05070102 : f32
    %56 = vector.broadcast %cst_24 : f32 to vector<16x128xf32>
    %57 = arith.mulf %56, %55 : vector<16x128xf32>
    %58 = vector.shape_cast %57 : vector<16x128xf32> to vector<1x16x128xf32>
    %c0_25 = arith.constant 0 : index
    %c0_26 = arith.constant 0 : index
    %c0_27 = arith.constant 0 : index
    %59 = vector.load %arg8[%c0_25, %c0_26, %c0_27] : memref<1x16x128xf32, #tpu.memory_space<vmem>>, vector<1x16x128xf32>
    tpu.vector_store %arg8[%c0_25, %c0_26, %c0_27], %58 {strides = array<i32>} : memref<1x16x128xf32, #tpu.memory_space<vmem>>, vector<1x16x128xf32>,
    return
  }
  func.func @transform_0(%arg0: i32) -> (i32, i32, i32) {
    %c0_i32 = arith.constant 0 : i32
    %c0_i32_0 = arith.constant 0 : i32
    %c0_i32_1 = arith.constant 0 : i32
    return %arg0, %c0_i32, %c0_i32_0 : i32, i32, i32
  }
  func.func @transform_1(%arg0: i32) -> (i32, i32) {
    %c0_i32 = arith.constant 0 : i32
    %c0_i32_0 = arith.constant 0 : i32
    %c0_i32_1 = arith.constant 0 : i32
    return %c0_i32, %c0_i32_0 : i32, i32
  }
  func.func @transform_2(%arg0: i32) -> (i32, i32) {
    %c0_i32 = arith.constant 0 : i32
    %c0_i32_0 = arith.constant 0 : i32
    %c0_i32_1 = arith.constant 0 : i32
    return %c0_i32, %c0_i32_0 : i32, i32
  }
  func.func @transform_3(%arg0: i32) -> (i32, i32) {
    %c0_i32 = arith.constant 0 : i32
    %c0_i32_0 = arith.constant 0 : i32
    %c0_i32_1 = arith.constant 0 : i32
    return %c0_i32, %c0_i32_0 : i32, i32
  }
  func.func @transform_4(%arg0: i32) -> (i32, i32) {
    %c0_i32 = arith.constant 0 : i32
    %c0_i32_0 = arith.constant 0 : i32
    %c0_i32_1 = arith.constant 0 : i32
    return %c0_i32, %c0_i32_0 : i32, i32
  }
  func.func @transform_5(%arg0: i32) -> (i32, i32) {
    %c0_i32 = arith.constant 0 : i32
    %c0_i32_0 = arith.constant 0 : i32
    %c0_i32_1 = arith.constant 0 : i32
    return %c0_i32, %c0_i32_0 : i32, i32
  }
  func.func @transform_6(%arg0: i32) -> (i32, i32) {
    %c0_i32 = arith.constant 0 : i32
    %c0_i32_0 = arith.constant 0 : i32
    %c0_i32_1 = arith.constant 0 : i32
    return %c0_i32, %c0_i32_0 : i32, i32
  }
  func.func @transform_7(%arg0: i32) -> (i32, i32, i32) {
    %c0_i32 = arith.constant 0 : i32
    %c0_i32_0 = arith.constant 0 : i32
    %c0_i32_1 = arith.constant 0 : i32
    return %arg0, %c0_i32, %c0_i32_0 : i32, i32, i32
  }
}

</mosaic_0001>

<bundles_post_ra>
// kernel: _pallas_forward.1
= control target key start
LH: loop header
LB: loop body
LE: loop exit
PB: predicated region body
PF: predicated region fallthrough
CT: control target
= control target key end

     0   :  { %s3210_s0 = inlined_call_operand.hbm [shape: f32[2,16,32], index: 0, kind: input, shape index: {}]   ;;  %s3211_s1 = inlined_call_operand.hbm [shape: bf16[32,128], index: 1, kind: input, shape index: {}]   ;;  %s3212_s2 = inlined_call_operand.vmem [shape: f32[1,128], index: 2, kind: input, shape index: {}]   ;;  %s3213_s3 = inlined_call_operand.vmem [shape: f32[1,128], index: 3, kind: input, shape index: {}]   ;;  %s3214_s4 = inlined_call_operand.hbm [shape: bf16[32,128], index: 4, kind: input, shape index: {}]   ;;  %s3215_s5 = inlined_call_operand.hbm [shape: bf16[32,128], index: 5, kind: input, shape index: {}]   ;;  %s3216_s6 = inlined_call_operand.vmem [shape: f32[1,128], index: 6, kind: input, shape index: {}]   ;;  %s3217_s7 = inlined_call_operand.hbm [shape: f32[2,16,128], index: 7, kind: output, shape index: {}]  }
   0x1   :  { %3218 = sst [smem:[#allocation15_spill]] %s3211_s1 }
   0x2   :  { %12 = vsyncpa [#allocation3], 0 }
   0x3   :  { %14 = vsyncpa [#allocation3 + $0x1], 0 }
   0x4   :  { %15 = vsyncpa [#allocation6], 0 }
   0x5   :  { %16 = vsyncpa [#allocation9], 0 }
   0x6   :  { %17 = vsyncpa [#allocation4], 0 }
   0x7   :  { %19 = vsyncpa [#allocation4 + $0x1], 0  ;;  %s2371_s24 = smov 0   ;;  %s2373_s25 = smov 0  }
   0x8   :  { %s2375_s26 = smov 0   ;;  %s2377_s27 = smov 0  }
   0x9 LB: > { %s2392_s28 = sadd.s32 4294967295, %s2319_s27   ;;  %s1786_s29 = sadd.s32 4294967294, %s2319_s27   ;;  %s2319_s27 = sphi %s2377_s27, %s3230_s27   ;;  %s2315_s26 = sphi %s2375_s26, %s3229_s26   ;;  %s2311_s25 = sphi %s2373_s25, %s3228_s25   ;;  %s2307_s24 = sphi %s2371_s24, %s3227_s24  }
   0xa   : > { %p45_p0 = scmp.ne.s32.totalorder %s2311_s25, %s2307_s24  ;;  %p46_p1 = scmp.eq.s32.totalorder %s2392_s28, 0 }
   0xb   : > { %p195_p2 = scmp.eq.s32.totalorder %s2392_s28, 1  ;;  %p201_p3 = scmp.eq.s32.totalorder %s1786_s29, 1 }
   0xc   : > { %p2401_p4 = por %p46_p1, %p45_p0  ;;  %p1787_p5 = scmp.ge.s32.totalorder %s2319_s27, 1 }
   0xd   : > { %p2406_p6 = por %p201_p3, %p45_p0  ;;  %p208_p7 = scmp.lt.s32.totalorder %s2319_s27, 3 }
   0xe   : > { %s3221_s1 = sld [smem:[#allocation15_spill]]  ;;  %s2321_s13 = smov [#allocation5]  }
   0xf   : > { %p2414_p8 = pnand %p1787_p5, %p208_p7  ;;  %s221_s14 = sshll.u32 %s2321_s13, 4  ;;  %s222_s14 = int_to_ptr.vmem [resolvable:$true] %s221_s14 }
  0x10   : > { %s239_s18 = sshll.u32 %s3214_s4, 4  ;;  %s2322_s19 = smov 64   ;;  %s240_s18 = int_to_ptr.hbm [resolvable:$true] %s239_s18 }
  0x11   : > { %p1913_p9 = pneg %p2414_p8  ;;  %s2323_s20 = smov 4  }
  0x12   : > { %s2324_s21 = smov [#allocation7]   ;;  %s253_s9 = sshll.u32 %s3215_s5, 4  ;;  %s254_s9 = int_to_ptr.hbm [resolvable:$true] %s253_s9 }
  0x13   : > { %p2422_p10 = pnand %p1913_p9, %p46_p1  ;;  %s241_s22 = sshll.u32 %s2324_s21, 4  ;;  %s242_s22 = int_to_ptr.vmem [resolvable:$true] %s241_s22 }
  0x14   : > { %s219_s11 = sshll.u32 %s3221_s1, 4  ;;  %s2325_s10 = smov [#allocation8]   ;;  %s220_s11 = int_to_ptr.hbm [resolvable:$true] %s219_s11 }
  0x15   : > { %1916 = dma.hbm_to_vmem [thread:$0]  (!%p2422_p10), %s220_s11, 256, %s222_s14, [#allocation6], %s2322_s19, %s2322_s19, %s2323_s20  }
  0x16   : > { %1919 = dma.hbm_to_vmem [thread:$0]  (!%p2422_p10), %s240_s18, 256, %s242_s22, [#allocation6], %s2322_s19, %s2322_s19, %s2323_s20  }
  0x17   : > { %s255_s13 = sshll.u32 %s2325_s10, 4  ;;  %s2438_s11 = sadd.s32 1, %s2319_s27   ;;  %s256_s13 = int_to_ptr.vmem [resolvable:$true] %s255_s13 }
  0x18   : > { %1922 = dma.hbm_to_vmem [thread:$0]  (!%p2422_p10), %s254_s9, 256, %s256_s13, [#allocation9], %s2322_s19, %s2322_s19, %s2323_s20  }
  0x19   : > { %s29_s14 = ssub.s32 %s2319_s27, %s2438_s11  ;;  %s32_s16 = sadd.s32 1, %s2315_s26 }
  0x1a   : > { %p30_p12 = scmp.eq.s32.totalorder %s29_s14, 0  ;;  %p39_p13 = scmp.ne.s32.totalorder %s2315_s26, %s2311_s25 }
  0x1b   : > { %p40_p0 = scmp.eq.s32.totalorder %s2319_s27, 0  ;;  %p1934_p3 = scmp.lt.s32.totalorder %s2319_s27, 2 }
  0x1c   : > { %s2450_s17 = scalar_select %p30_p12, %s2315_s26, %s32_s16  }
  0x1d   : > { %p41_p5 = por %p40_p0, %p39_p13  ;;  %p2454_p7 = por %p195_p2, %p39_p13 }
  0x1e   : > { %s272_s21 = sand.u32 1, %s2315_s26   ;;  %s1883_s22 = sshll.u32 %s2319_s27, 4 }
  0x1f   : > { %s1792_s15 = sshll.u32 %s272_s21, 4  ;;  %s281_s20 = scalar_lea.hbm %s3210_s0, %s1883_s22 }
  0x20   : > { %s282_s29 = sshll.u32 %s281_s20, 4  ;;  %s276_s9 = scalar_lea.vmem [#allocation2], %s1792_s15  ;;  %s283_s29 = int_to_ptr.hbm [resolvable:$true] %s282_s29 }
  0x21   : > { %s284_s10 = sshll.u32 %s276_s9, 4  ;;  %p2465_p9 = pnand %p1934_p3, %p41_p5  ;;  %s285_s10 = int_to_ptr.vmem [resolvable:$true] %s284_s10 }
  0x22   : > { %s273_s14 = scalar_lea.sflag [#allocation3], %s272_s21  ;;  %s2215_s16 = sshra.s32 %s283_s29, 4  ;;  %s2216_s16 = int_to_ptr.hbm [resolvable:$true] %s2215_s16 }
  0x23   : > { %s2217_s1 = scalar_lea.hbm %s2216_s16, 16  ;;  %p2219_p10 = pneg %p2465_p9 }
  0x24   : > { %p2218_p2 = scmp.ne.s32.totalorder %s2216_s16, %s2217_s1  ;;  %s2222_s23 = scalar_lea.hbm %s3210_s0, 32 }
  0x25   : > { %p2223_p0 = scmp.lt.s32.totalorder %s2216_s16, %s3210_s0  ;;  %p2224_p3 = scmp.lt.s32.totalorder %s2222_s23, %s2217_s1 }
  0x26   : > { %p2220_p12 = pnand %p2219_p10, %p2218_p2 }
  0x27   : > { %p2225_p5 = por %p2224_p3, %p2223_p0 }
  0x28   : > { %p2221_p13 = pneg %p2220_p12 }
  0x2a   : > { %p2226_p11 = pnand %p2225_p5, %p2221_p13 }
  0x2c   : > { %2229 = shalt.err (!%p2226_p11)
}
  0x2d   : > { %s2326_s21 = smov 128   ;;  %s2327_s9 = smov 8  }
  0x2e   : > { %1926 = dma.hbm_to_vmem [thread:$0]  (!%p2465_p9), %s283_s29, 256, %s285_s10, %s273_s14, %s2326_s21, %s2326_s21, %s2327_s9  }
  0x2f   : > { %296 = sbr.rel (%p2414_p8) target bundleno = 1342 (0x53e), region = 48  ;;  %s2482_s22 = sand.u32 (!%p2414_p8), 1, %s2311_s25  }
  0x30   : > { %s1796_s16 = sshll.u32 (!%p2414_p8), %s2482_s22, 4  ;;  %s299_s1 = scalar_lea.sflag (!%p2414_p8), [#allocation3], %s2482_s22 }
  0x31   : > { %s2488_s15 = scalar_lea.vmem (!%p2414_p8), [#allocation2], %s1796_s16 }
  0x34   : > { %2290 = dma.done.wait (%p2401_p4), %s299_s1, 256  }
  0x35   : > { %2292 = vsyncadd (%p2401_p4), %s299_s1, 4294967040 }
  0x36   : > { %2294 = dma.done.wait (%p46_p1), [#allocation6], 512  }
  0x37   : > { %2296 = vsyncadd (%p46_p1), [#allocation6], 4294966784 }
  0x38   : > { %2298 = dma.done.wait (%p46_p1), [#allocation9], 256  }
  0x39   : > { %2300 = vsyncadd (%p46_p1), [#allocation9], 4294967040  ;;  %v1885_v0 = vld [vmem:[#allocation5 + $0x8] sm:$0xff]  ;;  %v2503_v1 = vld [vmem:[%s2488_s15] sm:$0xff]  ;;  %vm468_vm0 = vcmask 261120   ;;  %vm775_vm1 = vcmask 130112  }
  0x3a   : > { %v2506_v2 = vld [vmem:[%s2488_s15 + $0x8] sm:$0xff]  ;;  %v368_v3 = vperm.slane %v2503_v1, 0  ;;  %v358_v4 = vrot.slane %v2503_v1, 5  ;;  %523 = vmatpush.bf16.msra.mxu0 %v1885_v0  ;;  %1892 = vmatpush.bf16.msra.mxu2 %v1885_v0  ;;  %v1884_v5 = vld [vmem:[#allocation5] sm:$0xff]  ;;  %v354_v23 = vrot.slane %v2503_v1, 1  ;;  %v359_v25 = vrot.slane %v2503_v1, 6 }
  0x3b   : > { %v361_v6 = vrot.slane %v2506_v2, 1  ;;  %v365_v7 = vrot.slane %v2506_v2, 5  ;;  %1893 = vmatpush.bf16.msra.mxu3 %v1885_v0  ;;  %1891 = vmatpush.bf16.msra.mxu1 %v1885_v0  ;;  %v362_v24 = vrot.slane %v2506_v2, 2  ;;  %v366_v26 = vrot.slane %v2506_v2, 6  ;;  %s1890_s23 = sshll.u32 %s2392_s28, 4  ;;  %s348_s9 = scalar_lea.vmem [#allocation10], %s1796_s16 }
  0x3c   : > { %v400_v8 = vmul.f32 %v368_v3, %v2503_v1  ;;  %v401_v9 = vmul.f32 %v368_v3, %v2506_v2  ;;  %v373_v10 = vperm.slane %v358_v4, 0  ;;  %v369_v27 = vperm.slane %v354_v23, 0  ;;  %s1680_s21 = scalar_lea.hbm %s3217_s7, %s1890_s23  ;;  %s1681_s1 = sshll.u32 %s348_s9, 4  ;;  %s1682_s1 = int_to_ptr.vmem [resolvable:$true] %s1681_s1 }
  0x3d   : > { %v377_v11 = vperm.slane %v361_v6, 0  ;;  %v381_v12 = vperm.slane %v365_v7, 0  ;;  %v378_v28 = vperm.slane %v362_v24, 0  ;;  %v374_v29 = vperm.slane %v359_v25, 0  ;;  %s1669_s28 = scalar_lea.sflag [#allocation4], %s2482_s22  ;;  %s2265_s10 = scalar_lea.hbm %s3217_s7, 32 }
  0x3e   : > { %v432_v13 = vpack.c.bf16 %v401_v9, %v400_v8  ;;  %v410_v14 = vmul.f32 %v373_v10, %v2503_v1  ;;  %v411_v15 = vmul.f32 %v373_v10, %v2506_v2  ;;  %524 = vmatpush.bf16.msra.mxu0 %v1884_v5  ;;  %1895 = vmatpush.bf16.msra.mxu2 %v1884_v5  ;;  %v382_v30 = vperm.slane %v366_v26, 0 }
  0x3f   : > { %v418_v16 = vmul.f32 %v377_v11, %v2503_v1  ;;  %v419_v17 = vmul.f32 %v377_v11, %v2506_v2  ;;  %v426_v18 = vmul.f32 %v381_v12, %v2503_v1  ;;  %1896 = vmatpush.bf16.msra.mxu3 %v1884_v5  ;;  %v427_v19 = vmul.f32 %v381_v12, %v2506_v2 }
  0x40   : > { %1894 = vmatpush.bf16.msra.mxu1 %v1884_v5  ;;  %v437_v20 = vpack.c.bf16 %v411_v15, %v410_v14  ;;  %v402_v31 = vmul.f32 %v369_v27, %v2503_v1  ;;  %v403_v32 = vmul.f32 %v369_v27, %v2506_v2  ;;  %v420_v33 = vmul.f32 %v378_v28, %v2503_v1 }
  0x41   : > { %v441_v21 = vpack.c.bf16 %v419_v17, %v418_v16  ;;  %1809 = vmatmul.msk.bf16.vlgmr.msra.gmra.mxu0 %vm468_vm0, %v432_v13  ;;  %v445_v22 = vpack.c.bf16 %v427_v19, %v426_v18  ;;  %v421_v34 = vmul.f32 %v378_v28, %v2506_v2  ;;  %v412_v35 = vmul.f32 %v374_v29, %v2503_v1 }
  0x42   : > { %v413_v36 = vmul.f32 %v374_v29, %v2506_v2  ;;  %v428_v37 = vmul.f32 %v382_v30, %v2503_v1  ;;  %v429_v38 = vmul.f32 %v382_v30, %v2506_v2  ;;  %v433_v39 = vpack.c.bf16 %v403_v32, %v402_v31 }
  0x43   : > { %1818 = vmatmul.msk.bf16.vlgmr.msra.gmra.mxu2 %vm468_vm0, %v441_v21  ;;  %1814 = vmatmul.msk.bf16.vlgmr.msra.gmra.mxu1 %vm468_vm0, %v437_v20  ;;  %v442_v40 = vpack.c.bf16 %v421_v34, %v420_v33  ;;  %v355_v43 = vrot.slane %v2503_v1, 2  ;;  %v363_v44 = vrot.slane %v2506_v2, 3  ;;  %v360_v45 = vrot.slane %v2503_v1, 7  ;;  %v2575_v20 = vld [vmem:[%s3212_s2] ss:$0 sm:$0xff] }
  0x44   : > { %1822 = vmatmul.msk.bf16.vlgmr.msra.gmra.mxu3 %vm468_vm0, %v445_v22  ;;  %v438_v41 = vpack.c.bf16 %v413_v36, %v412_v35  ;;  %v446_v42 = vpack.c.bf16 %v429_v38, %v428_v37  ;;  %v367_v46 = vrot.slane %v2506_v2, 7  ;;  %v356_v63 = vrot.slane %v2503_v1, 3 }
  0x45   : > { %v370_v47 = vperm.slane %v355_v43, 0  ;;  %v379_v48 = vperm.slane %v363_v44, 0  ;;  %v375_v49 = vperm.slane %v360_v45, 0  ;;  %v364_v0 = vrot.slane %v2506_v2, 4 }
  0x46   : > { %v383_v50 = vperm.slane %v367_v46, 0  ;;  %v371_v3 = vperm.slane %v356_v63, 0  ;;  %v376_v5 = vperm.slane %v2506_v2, 0  ;;  %v357_v15 = vrot.slane %v2503_v1, 4 }
  0x47   : > { %v404_v51 = vmul.f32 %v370_v47, %v2503_v1  ;;  %v405_v52 = vmul.f32 %v370_v47, %v2506_v2  ;;  %v422_v53 = vmul.f32 %v379_v48, %v2503_v1  ;;  %v423_v54 = vmul.f32 %v379_v48, %v2506_v2 }
  0x48   : > { %v414_v55 = vmul.f32 %v375_v49, %v2503_v1  ;;  %v415_v56 = vmul.f32 %v375_v49, %v2506_v2  ;;  %v430_v57 = vmul.f32 %v383_v50, %v2503_v1  ;;  %v431_v58 = vmul.f32 %v383_v50, %v2506_v2 }
  0x49   : > { %v434_v59 = vpack.c.bf16 %v405_v52, %v404_v51  ;;  %v443_v60 = vpack.c.bf16 %v423_v54, %v422_v53  ;;  %v380_v4 = vperm.slane %v364_v0, 0  ;;  %v406_v6 = vmul.f32 %v371_v3, %v2503_v1 }
  0x4a   : > { %v439_v61 = vpack.c.bf16 %v415_v56, %v414_v55  ;;  %v447_v62 = vpack.c.bf16 %v431_v58, %v430_v57  ;;  %v407_v7 = vmul.f32 %v371_v3, %v2506_v2  ;;  %v416_v10 = vmul.f32 %v376_v5, %v2503_v1 }
  0x4b   : > { %v424_v8 = vmul.f32 %v380_v4, %v2503_v1  ;;  %v425_v9 = vmul.f32 %v380_v4, %v2506_v2  ;;  %v417_v11 = vmul.f32 %v376_v5, %v2506_v2  ;;  %v372_v16 = vperm.slane %v357_v15, 0 }
  0x4c   : > { %v435_v12 = vpack.c.bf16 %v407_v7, %v406_v6  ;;  %vm822_vm2 = vcmask 1041409   ;;  %vm824_vm3 = vcmask 1042434   ;;  %vm826_vm4 = vcmask 1043459  }
  0x4d   : > { %v444_v13 = vpack.c.bf16 %v425_v9, %v424_v8  ;;  %v440_v14 = vpack.c.bf16 %v417_v11, %v416_v10  ;;  %v408_v17 = vmul.f32 %v372_v16, %v2503_v1  ;;  %v409_v18 = vmul.f32 %v372_v16, %v2506_v2  ;;  %v2582_v1 = vld [vmem:[%s3213_s3] ss:$0 sm:$0xff] }
  0x4e   : > { %vm828_vm5 = vcmask 1044484   ;;  %vm830_vm6 = vcmask 1045509   ;;  %vm832_vm7 = vcmask 1046534   ;;  %vm834_vm8 = vcmask 1047559  }
  0x4f   : > { %v436_v19 = vpack.c.bf16 %v409_v18, %v408_v17  ;;  %vm845_vm9 = vcmask 130048  }
  0x51   : > { %1810 = vmatmul.msk.bf16.gmra.mxu0 %vm468_vm0, %v433_v39 }
  0x53   : > { %1819 = vmatmul.msk.bf16.gmra.mxu2 %vm468_vm0, %v442_v40  ;;  %1815 = vmatmul.msk.bf16.gmra.mxu1 %vm468_vm0, %v438_v41 }
  0x54   : > { %1823 = vmatmul.msk.bf16.gmra.mxu3 %vm468_vm0, %v446_v42 }
  0x61   : > { %1811 = vmatmul.msk.bf16.gmra.mxu0 %vm468_vm0, %v434_v59 }
  0x63   : > { %1820 = vmatmul.msk.bf16.gmra.mxu2 %vm468_vm0, %v443_v60  ;;  %1816 = vmatmul.msk.bf16.gmra.mxu1 %vm468_vm0, %v439_v61 }
  0x64   : > { %1824 = vmatmul.msk.bf16.gmra.mxu3 %vm468_vm0, %v447_v62 }
  0x71   : > { %1812 = vmatmul.msk.bf16.gmra.mxu0 %vm468_vm0, %v435_v12 }
  0x73   : > { %1821 = vmatmul.msk.bf16.gmra.mxu2 %vm468_vm0, %v444_v13  ;;  %1817 = vmatmul.msk.bf16.gmra.mxu1 %vm468_vm0, %v440_v14 }
  0x81   : > { %1813 = vmatmul.msk.bf16.gmra.mxu0 %vm468_vm0, %v436_v19 }
  0xbe   : > { %v526_v21 = vpop.f32.mrf.mxu0 }
  0xbf   : > { %v527_v22 = vadd.f32 %v2575_v20, %v526_v21 }
  0xc0   : > { %v551_v23 = vpop.f32.mrf.mxu1 }
  0xc1   : > { %v552_v24 = vadd.f32 %v2575_v20, %v551_v23  ;;  %1987 = vtanh.f32 %v527_v22 }
  0xc3   : > { %1989 = vtanh.f32 %v552_v24 }
  0xc6   : > { %v571_v2 = vpop.f32.mrf.mxu2  ;;  %v528_v27 = vpop.f32.mrf.mxu0 }
  0xc7   : > { %v572_v25 = vadd.f32 %v2575_v20, %v571_v2  ;;  %v591_v26 = vpop.f32.mrf.mxu3  ;;  %v1988_v28 = vpop.eup %1987  ;;  %v529_v34 = vadd.f32 %v2575_v20, %v528_v27 }
  0xc8   : > { %v592_v29 = vadd.f32 %v2575_v20, %v591_v26  ;;  %v553_v30 = vpop.f32.mrf.mxu1  ;;  %v642_v32 = vmul.f32 %v1988_v28, %v2582_v1 }
  0xc9   : > { %v1990_v31 = vpop.eup %1989  ;;  %1991 = vtanh.f32 %v572_v25  ;;  %v554_v46 = vadd.f32 %v2575_v20, %v553_v30 }
  0xca   : > { %1993 = vtanh.f32 %v592_v29  ;;  %v652_v33 = vmul.f32 %v1990_v31, %v2582_v1  ;;  %674 = vadd.xlane.f32.xlu0 %v642_v32 }
  0xcb   : > { %1995 = vtanh.f32 %v529_v34 }
  0xcc   : > { %694 = vadd.xlane.f32.xlu2 %v652_v33 }
  0xce   : > { %v573_v35 = vpop.f32.mrf.mxu2  ;;  %v531_v39 = vpop.f32.mrf.mxu0 }
  0xcf   : > { %v1992_v36 = vpop.eup %1991  ;;  %v574_v37 = vadd.f32 %v2575_v20, %v573_v35  ;;  %v593_v38 = vpop.f32.mrf.mxu3  ;;  %v532_v45 = vadd.f32 %v2575_v20, %v531_v39 }
  0xd0   : > { %v1994_v40 = vpop.eup %1993  ;;  %v594_v41 = vadd.f32 %v2575_v20, %v593_v38  ;;  %v660_v42 = vmul.f32 %v1992_v36, %v2582_v1  ;;  %v556_v43 = vpop.f32.mrf.mxu1 }
  0xd1   : > { %1997 = vtanh.f32 %v574_v37  ;;  %v668_v44 = vmul.f32 %v1994_v40, %v2582_v1  ;;  %v1996_v47 = vpop.eup %1995  ;;  %v557_v59 = vadd.f32 %v2575_v20, %v556_v43 }
  0xd2   : > { %1999 = vtanh.f32 %v594_v41  ;;  %710 = vadd.xlane.f32.xlu0 %v660_v42  ;;  %v643_v58 = vmul.f32 %v1996_v47, %v2582_v1 }
  0xd3   : > { %726 = vadd.xlane.f32.xlu1 %v668_v44  ;;  %2001 = vtanh.f32 %v532_v45 }
  0xd4   : > { %2003 = vtanh.f32 %v554_v46 }
  0xd6   : > { %v576_v48 = vpop.f32.mrf.mxu2  ;;  %v533_v51 = vpop.f32.mrf.mxu0 }
  0xd7   : > { %v1998_v49 = vpop.eup %1997  ;;  %v596_v50 = vpop.f32.mrf.mxu3  ;;  %v577_v57 = vadd.f32 %v2575_v20, %v576_v48  ;;  %v534_v11 = vadd.f32 %v2575_v20, %v533_v51 }
  0xd8   : > { %v2000_v52 = vpop.eup %1999  ;;  %v597_v53 = vadd.f32 %v2575_v20, %v596_v50  ;;  %v661_v54 = vmul.f32 %v1998_v49, %v2582_v1  ;;  %v558_v56 = vpop.f32.mrf.mxu1 }
  0xd9   : > { %v669_v55 = vmul.f32 %v2000_v52, %v2582_v1  ;;  %v2002_v60 = vpop.eup %2001  ;;  %v559_v25 = vadd.f32 %v2575_v20, %v558_v56 }
  0xda   : > { %2005 = vtanh.f32 %v597_v53  ;;  %676 = vadd.xlane.f32.xlu0 %v643_v58  ;;  %v2004_v62 = vpop.eup %2003  ;;  %v644_v0 = vmul.f32 %v2002_v60, %v2582_v1 }
  0xdb   : > { %712 = vadd.xlane.f32.xlu1 %v661_v54  ;;  %728 = vadd.xlane.f32.xlu2 %v669_v55  ;;  %2007 = vtanh.f32 %v577_v57  ;;  %v653_v8 = vmul.f32 %v2004_v62, %v2582_v1 }
  0xdc   : > { %2009 = vtanh.f32 %v557_v59 }
  0xde   : > { %v578_v61 = vpop.f32.mrf.mxu2  ;;  %v536_v3 = vpop.f32.mrf.mxu0 }
  0xdf   : > { %v579_v63 = vadd.f32 %v2575_v20, %v578_v61  ;;  %v598_v7 = vpop.f32.mrf.mxu3  ;;  %v537_v9 = vadd.f32 %v2575_v20, %v536_v3 }
  0xe0   : > { %v2006_v4 = vpop.eup %2005  ;;  %v561_v6 = vpop.f32.mrf.mxu1  ;;  %v599_v13 = vadd.f32 %v2575_v20, %v598_v7 }
  0xe1   : > { %2011 = vtanh.f32 %v579_v63  ;;  %v670_v5 = vmul.f32 %v2006_v4, %v2582_v1  ;;  %v2008_v10 = vpop.eup %2007  ;;  %v562_v30 = vadd.f32 %v2575_v20, %v561_v6 }
  0xe2   : > { %696 = vadd.xlane.f32.xlu0 %v653_v8  ;;  %v2010_v12 = vpop.eup %2009  ;;  %2013 = vtanh.f32 %v537_v9  ;;  %v662_v15 = vmul.f32 %v2008_v10, %v2582_v1 }
  0xe3   : > { %730 = vadd.xlane.f32.xlu2 %v670_v5  ;;  %678 = vadd.xlane.f32.xlu1 %v644_v0  ;;  %2015 = vtanh.f32 %v534_v11  ;;  %v654_v19 = vmul.f32 %v2010_v12, %v2582_v1 }
  0xe4   : > { %2017 = vtanh.f32 %v599_v13 }
  0xe6   : > { %v538_v16 = vpop.f32.mrf.mxu0  ;;  %v581_v17 = vpop.f32.mrf.mxu2 }
  0xe7   : > { %v2012_v14 = vpop.eup %2011  ;;  %v601_v21 = vpop.f32.mrf.mxu3  ;;  %v582_v22 = vadd.f32 %v2575_v20, %v581_v17  ;;  %v539_v36 = vadd.f32 %v2575_v20, %v538_v16 }
  0xe8   : > { %v663_v18 = vmul.f32 %v2012_v14, %v2582_v1  ;;  %v602_v23 = vadd.f32 %v2575_v20, %v601_v21  ;;  %v563_v24 = vpop.f32.mrf.mxu1  ;;  %v2014_v2 = vpop.eup %2013 }
  0xe9   : > { %v2016_v26 = vpop.eup %2015  ;;  %2019 = vtanh.f32 %v582_v22  ;;  %v646_v28 = vmul.f32 %v2014_v2, %v2582_v1  ;;  %v564_v33 = vadd.f32 %v2575_v20, %v563_v24 }
  0xea   : > { %698 = vadd.xlane.f32.xlu0 %v654_v19  ;;  %v2018_v27 = vpop.eup %2017  ;;  %2021 = vtanh.f32 %v602_v23  ;;  %v645_v31 = vmul.f32 %v2016_v26, %v2582_v1 }
  0xeb   : > { %716 = vadd.xlane.f32.xlu2 %v663_v18  ;;  %714 = vadd.xlane.f32.xlu1 %v662_v15  ;;  %2023 = vtanh.f32 %v559_v25  ;;  %v671_v32 = vmul.f32 %v2018_v27, %v2582_v1 }
  0xec   : > { %2025 = vtanh.f32 %v562_v30 }
  0xed   : > { %2027 = vtanh.f32 %v564_v33 }
  0xee   : > { %v541_v29 = vpop.f32.mrf.mxu0  ;;  %v583_v39 = vpop.f32.mrf.mxu2  ;;  %2029 = vtanh.f32 %v539_v36 }
  0xef   : > { %v2020_v34 = vpop.eup %2019  ;;  %v603_v43 = vpop.f32.mrf.mxu3  ;;  %v584_v49 = vadd.f32 %v2575_v20, %v583_v39  ;;  %v542_v60 = vadd.f32 %v2575_v20, %v541_v29 }
  0xf0   : > { %v2022_v35 = vpop.eup %2021  ;;  %v566_v37 = vpop.f32.mrf.mxu1  ;;  %v664_v40 = vmul.f32 %v2020_v34, %v2582_v1  ;;  %v604_v48 = vadd.f32 %v2575_v20, %v603_v43 }
  0xf1   : > { %v2024_v38 = vpop.eup %2023  ;;  %v672_v42 = vmul.f32 %v2022_v35, %v2582_v1  ;;  %v567_v45 = vadd.f32 %v2575_v20, %v566_v37 }
  0xf2   : > { %732 = vadd.xlane.f32.xlu0 %v671_v32  ;;  %v655_v44 = vmul.f32 %v2024_v38, %v2582_v1  ;;  %v2026_v46 = vpop.eup %2025 }
  0xf3   : > { %682 = vadd.xlane.f32.xlu2 %v646_v28  ;;  %680 = vadd.xlane.f32.xlu1 %v645_v31  ;;  %v2028_v47 = vpop.eup %2027  ;;  %2031 = vtanh.f32 %v567_v45  ;;  %v656_v53 = vmul.f32 %v2026_v46, %v2582_v1 }
  0xf4   : > { %v2030_v51 = vpop.eup %2029  ;;  %v657_v52 = vmul.f32 %v2028_v47, %v2582_v1  ;;  %2033 = vtanh.f32 %v604_v48 }
  0xf5   : > { %2035 = vtanh.f32 %v584_v49  ;;  %v647_v56 = vmul.f32 %v2030_v51, %v2582_v1 }
  0xf6   : > { %v543_v41 = vpop.f32.mrf.mxu0  ;;  %v586_v50 = vpop.f32.mrf.mxu2 }
  0xf7   : > { %v544_v59 = vadd.f32 %v2575_v20, %v543_v41  ;;  %v587_v9 = vadd.f32 %v2575_v20, %v586_v50 }
  0xf8   : > { %v568_v54 = vpop.f32.mrf.mxu1 }
  0xf9   : > { %v569_v57 = vadd.f32 %v2575_v20, %v568_v54  ;;  %v2032_v58 = vpop.eup %2031 }
  0xfa   : > { %734 = vadd.xlane.f32.xlu0 %v672_v42  ;;  %v2034_v61 = vpop.eup %2033  ;;  %v658_v63 = vmul.f32 %v2032_v58, %v2582_v1 }
  0xfb   : > { %718 = vadd.xlane.f32.xlu2 %v664_v40  ;;  %700 = vadd.xlane.f32.xlu1 %v655_v44  ;;  %2037 = vtanh.f32 %v569_v57  ;;  %v2036_v62 = vpop.eup %2035  ;;  %v673_v4 = vmul.f32 %v2034_v61, %v2582_v1  ;;  %v770_v44 = vlaneseq }
  0xfc   : > { %2039 = vtanh.f32 %v544_v59  ;;  %v665_v5 = vmul.f32 %v2036_v62, %v2582_v1 }
  0xfd   : > { %2041 = vtanh.f32 %v542_v60  ;;  %v2696_v48 = vand.u32 127, %v770_v44 }
  0xfe   : > { %v546_v55 = vpop.f32.mrf.mxu0  ;;  %v588_v3 = vpop.f32.mrf.mxu2 }
  0xff   : > { %v589_v8 = vadd.f32 %v2575_v20, %v588_v3  ;;  %v547_v14 = vadd.f32 %v2575_v20, %v546_v55  ;;  %v2699_v49 = vadd.s32 4294967288, %v2696_v48 }
 0x101   : > { %v2038_v7 = vpop.eup %2037 }
 0x102   : > { %684 = vadd.xlane.f32.xlu0 %v647_v56  ;;  %v2040_v10 = vpop.eup %2039  ;;  %v659_v12 = vmul.f32 %v2038_v7, %v2582_v1 }
 0x103   : > { %704 = vadd.xlane.f32.xlu2 %v657_v52  ;;  %702 = vadd.xlane.f32.xlu1 %v656_v53  ;;  %v2042_v11 = vpop.eup %2041  ;;  %v649_v13 = vmul.f32 %v2040_v10, %v2582_v1 }
 0x104   : > { %v648_v15 = vmul.f32 %v2042_v11, %v2582_v1 }
 0x106   : > { %v548_v0 = vpop.f32.mrf.mxu0 }
 0x107   : > { %v549_v6 = vadd.f32 %v2575_v20, %v548_v0 }
 0x109   : > { %2043 = vtanh.f32 %v549_v6 }
 0x10a   : > { %720 = vadd.xlane.f32.xlu0 %v665_v5  ;;  %2045 = vtanh.f32 %v589_v8 }
 0x10b   : > { %706 = vadd.xlane.f32.xlu2 %v658_v63  ;;  %736 = vadd.xlane.f32.xlu1 %v673_v4  ;;  %2047 = vtanh.f32 %v587_v9 }
 0x10c   : > { %2049 = vtanh.f32 %v547_v14 }
 0x10f   : > { %v2044_v16 = vpop.eup %2043 }
 0x110   : > { %v2046_v17 = vpop.eup %2045  ;;  %v651_v19 = vmul.f32 %v2044_v16, %v2582_v1 }
 0x111   : > { %v2048_v18 = vpop.eup %2047  ;;  %v667_v21 = vmul.f32 %v2046_v17, %v2582_v1 }
 0x112   : > { %686 = vadd.xlane.f32.xlu0 %v648_v15  ;;  %v666_v22 = vmul.f32 %v2048_v18, %v2582_v1  ;;  %v2050_v23 = vpop.eup %2049 }
 0x113   : > { %708 = vadd.xlane.f32.xlu2 %v659_v12  ;;  %688 = vadd.xlane.f32.xlu1 %v649_v13  ;;  %v650_v20 = vmul.f32 %v2050_v23, %v2582_v1 }
 0x11a   : > { %722 = vadd.xlane.f32.xlu0 %v666_v22 }
 0x11b   : > { %724 = vadd.xlane.f32.xlu1 %v667_v21  ;;  %692 = vadd.xlane.f32.xlu2 %v651_v19 }
 0x123   : > { %690 = vadd.xlane.f32.xlu1 %v650_v20 }
 0x13d   : > { %v2646_v24 = vpop.xlane.xlu0 %674 }
 0x13e   : > { %v772_v63 = vperm.slane %v2646_v24, %v2696_v48 }
 0x13f   : > { %v2648_v2 = vpop.xlane.xlu2 %694 }
 0x145   : > { %v2652_v26 = vpop.xlane.xlu0 %710 }
 0x146   : > { %v2650_v25 = vpop.xlane.xlu1 %726  ;;  %v801_v56 = vperm.slane %v2652_v26, %v2696_v48 }
 0x147   : > { %v813_v61 = vperm.slane %v2650_v25, %v2696_v48 }
 0x14d   : > { %v2658_v29 = vpop.xlane.xlu0 %676 }
 0x14e   : > { %v2654_v27 = vpop.xlane.xlu1 %712  ;;  %v2656_v28 = vpop.xlane.xlu2 %728  ;;  %v774_v4 = vperm.slane %v2658_v29, %v2699_v49 }
 0x14f   : > { %v802_v53 = vperm.slane %v2654_v27, %v2699_v49  ;;  %v814_v57 = vperm.slane %v2656_v28, %v2699_v49 }
 0x151   : > { %v803_v62 = vsel %vm775_vm1, %v802_v53, %v801_v56  ;;  %v815_v3 = vsel %vm775_vm1, %v814_v57, %v813_v61 }
 0x155   : > { %v2664_v1 = vpop.xlane.xlu0 %696 }
 0x156   : > { %v2660_v30 = vpop.xlane.xlu2 %730  ;;  %v2662_v31 = vpop.xlane.xlu1 %678 }
 0x157   : > { %v816_v5 = vperm.slane %v2660_v30, %v2696_v48  ;;  %v777_v7 = vperm.slane %v2662_v31, %v2696_v48 }
 0x15d   : > { %v2670_v34 = vpop.xlane.xlu0 %698 }
 0x15e   : > { %v2666_v32 = vpop.xlane.xlu2 %716  ;;  %v2668_v33 = vpop.xlane.xlu1 %714 }
 0x15f   : > { %v805_v59 = vperm.slane %v2666_v32, %v2699_v49  ;;  %v804_v60 = vperm.slane %v2668_v33, %v2696_v48 }
 0x161   : > { %v806_v8 = vsel %vm775_vm1, %v805_v59, %v804_v60 }
 0x165   : > { %v2676_v37 = vpop.xlane.xlu0 %732 }
 0x166   : > { %v2672_v35 = vpop.xlane.xlu2 %682  ;;  %v2674_v36 = vpop.xlane.xlu1 %680  ;;  %v817_v15 = vperm.slane %v2676_v37, %v2699_v49 }
 0x167   : > { %v780_v9 = vperm.slane %v2672_v35, %v2696_v48  ;;  %v778_v11 = vperm.slane %v2674_v36, %v2699_v49 }
 0x168   : > { %v818_v57 = vsel %vm775_vm1, %v817_v15, %v816_v5 }
 0x16d   : > { %v2682_v40 = vpop.xlane.xlu0 %734 }
 0x16e   : > { %v2678_v38 = vpop.xlane.xlu2 %718  ;;  %v2680_v39 = vpop.xlane.xlu1 %700  ;;  %v819_v53 = vperm.slane %v2682_v40, %v2696_v48 }
 0x16f   : > { %v807_v12 = vperm.slane %v2678_v38, %v2696_v48 }
 0x175   : > { %v2688_v43 = vpop.xlane.xlu0 %684 }
 0x176   : > { %v2684_v41 = vpop.xlane.xlu2 %704  ;;  %v2686_v42 = vpop.xlane.xlu1 %702  ;;  %v781_v18 = vperm.slane %v2688_v43, %v2699_v49 }
 0x178   : > { %v782_v59 = vsel %vm775_vm1, %v781_v18, %v780_v9  ;;  %v793_v9 = vperm.slane %v2680_v39, %v2699_v49 }
 0x17d   : > { %v2694_v47 = vpop.xlane.xlu0 %720 }
 0x17e   : > { %v2690_v45 = vpop.xlane.xlu2 %706  ;;  %v2692_v46 = vpop.xlane.xlu1 %736  ;;  %v808_v6 = vperm.slane %v2694_v47, %v2699_v49 }
 0x17f   : > { %v798_v50 = vperm.slane %v2690_v45, %v2696_v48  ;;  %v820_v19 = vperm.slane %v2692_v46, %v2699_v49 }
 0x180   : > { %v809_v21 = vsel %vm775_vm1, %v808_v6, %v807_v12  ;;  %v790_v6 = vperm.slane %v2664_v1, %v2699_v49 }
 0x181   : > { %v821_v61 = vsel %vm775_vm1, %v820_v19, %v819_v53 }
 0x185   : > { %v2711_v55 = vpop.xlane.xlu0 %686 }
 0x186   : > { %v2703_v51 = vpop.xlane.xlu2 %708  ;;  %v2705_v52 = vpop.xlane.xlu1 %688  ;;  %v783_v22 = vperm.slane %v2711_v55, %v2696_v48 }
 0x187   : > { %v799_v54 = vperm.slane %v2703_v51, %v2699_v49  ;;  %v784_v56 = vperm.slane %v2705_v52, %v2699_v49 }
 0x189   : > { %v800_v58 = vsel %vm775_vm1, %v799_v54, %v798_v50  ;;  %v779_v50 = vsel %vm775_vm1, %v778_v11, %v777_v7  ;;  %v785_v7 = vsel %vm775_vm1, %v784_v56, %v783_v22  ;;  %v2328_v56 = vmov 0  }
 0x18a   : > { %v836_v0 = vsel %vm822_vm2, %v803_v62, %v800_v58  ;;  %1983 = vset.pattern.permute.xlu0 %v2328_v56  ;;  %1982 = vset.pattern.permute.xlu2 %v2328_v56 }
 0x18b   : > { %v837_v13 = vsel %vm824_vm3, %v806_v8, %v836_v0  ;;  %v776_v0 = vsel %vm775_vm1, %v774_v4, %v772_v63  ;;  %v789_v63 = vperm.slane %v2648_v2, %v2696_v48  ;;  %v796_v4 = vperm.slane %v2684_v41, %v2699_v49  ;;  %1981 = vset.pattern.permute.xlu1 %v2328_v56 }
 0x18c   : > { %v838_v44 = vsel %vm826_vm4, %v809_v21, %v837_v13  ;;  %v823_v8 = vsel %vm822_vm2, %v779_v50, %v776_v0  ;;  %v795_v13 = vperm.slane %v2686_v42, %v2696_v48 }
 0x18d   : > { %v2747_v14 = vpop.xlane.xlu0 %722  ;;  %v825_v15 = vsel %vm824_vm3, %v782_v59, %v823_v8  ;;  %v791_v19 = vsel %vm775_vm1, %v790_v6, %v789_v63 }
 0x18e   : > { %v2740_v10 = vpop.xlane.xlu1 %724  ;;  %v810_v17 = vperm.slane %v2747_v14, %v2696_v48  ;;  %v2763_v20 = vpop.xlane.xlu2 %692 }
 0x18f   : > { %v811_v16 = vperm.slane %v2740_v10, %v2699_v49  ;;  %v787_v60 = vperm.slane %v2763_v20, %v2699_v49 }
 0x191   : > { %v812_v23 = vsel %vm775_vm1, %v811_v16, %v810_v17  ;;  %v792_v16 = vperm.slane %v2670_v34, %v2696_v48  ;;  %v827_v17 = vsel %vm826_vm4, %v785_v7, %v825_v15 }
 0x192   : > { %v839_v54 = vsel %vm828_vm5, %v812_v23, %v838_v44  ;;  %v797_v44 = vsel %vm775_vm1, %v796_v4, %v795_v13 }
 0x193   : > { %v840_v58 = vsel %vm830_vm6, %v815_v3, %v839_v54  ;;  %v794_v22 = vsel %vm775_vm1, %v793_v9, %v792_v16 }
 0x194   : > { %v841_v62 = vsel %vm832_vm7, %v818_v57, %v840_v58 }
 0x195   : > { %v842_v3 = vsel %vm834_vm8, %v821_v61, %v841_v62 }
 0x196   : > { %v2783_v5 = vpop.xlane.xlu1 %690  ;;  %v849_v12 = vsel %vm845_vm9, %v842_v3, -inf }
 0x197   : > { %v786_v11 = vperm.slane %v2783_v5, %v2696_v48  ;;  %850 = vmax.xlane.f32.xlu0 %v849_v12 }
 0x199   : > { %v788_v18 = vsel %vm775_vm1, %v787_v60, %v786_v11 }
 0x19a   : > { %v829_v21 = vsel %vm828_vm5, %v788_v18, %v827_v17 }
 0x19b   : > { %v831_v23 = vsel %vm830_vm6, %v791_v19, %v829_v21 }
 0x19c   : > { %v833_v50 = vsel %vm832_vm7, %v794_v22, %v831_v23 }
 0x19d   : > { %v835_v53 = vsel %vm834_vm8, %v797_v44, %v833_v50 }
 0x19e   : > { %v846_v54 = vsel %vm845_vm9, %v835_v53, -inf }
 0x19f   : > { %847 = vmax.xlane.f32.xlu2 %v846_v54 }
 0x20a   : > { %v2811_v57 = vpop.xlane.xlu0 %850 }
 0x20b   : > { %v865_v58 = vperm.slane %v2811_v57, 3  ;;  %v862_v59 = vperm.slane %v2811_v57, 0  ;;  %v866_v0 = vperm.slane %v2811_v57, 4  ;;  %v863_v6 = vperm.slane %v2811_v57, 1 }
 0x20c   : > { %v864_v63 = vperm.slane %v2811_v57, 2  ;;  %v869_v18 = vperm.slane %v2811_v57, 7 }
 0x20d   : > { %v909_v60 = vsub.f32 %v2694_v47, %v865_v58  ;;  %v902_v61 = vsub.f32 %v2690_v45, %v862_v59  ;;  %v903_v62 = vsub.f32 %v2703_v51, %v862_v59  ;;  %v910_v9 = vsub.f32 %v2747_v14, %v866_v0 }
 0x20e   : > { %v904_v11 = vsub.f32 %v2652_v26, %v863_v6  ;;  %v905_v47 = vsub.f32 %v2654_v27, %v863_v6  ;;  %v868_v45 = vperm.slane %v2811_v57, 6  ;;  %v907_v27 = vsub.f32 %v2666_v32, %v864_v63 }
 0x20f   : > { %v964_v7 = vmul.f32 1.442695, %v909_v60  ;;  %v950_v3 = vmul.f32 1.442695, %v902_v61  ;;  %v952_v8 = vmul.f32 1.442695, %v903_v62  ;;  %v906_v16 = vsub.f32 %v2668_v33, %v864_v63 }
 0x210   : > { %v966_v12 = vmul.f32 1.442695, %v910_v9  ;;  %v954_v51 = vmul.f32 1.442695, %v904_v11  ;;  %v956_v13 = vmul.f32 1.442695, %v905_v47  ;;  %v915_v26 = vsub.f32 %v2676_v37, %v868_v45 }
 0x211   : > { %2051 = vpow2.f32 %v964_v7  ;;  %v960_v19 = vmul.f32 1.442695, %v907_v27  ;;  %v958_v22 = vmul.f32 1.442695, %v906_v16  ;;  %v916_v32 = vsub.f32 %v2682_v40, %v869_v18 }
 0x212   : > { %2053 = vpow2.f32 %v950_v3  ;;  %v976_v17 = vmul.f32 1.442695, %v915_v26  ;;  %v2849_v44 = vpop.xlane.xlu2 %847  ;;  %v908_v33 = vsub.f32 %v2678_v38, %v865_v58  ;;  %v911_v50 = vsub.f32 %v2740_v10, %v866_v0 }
 0x213   : > { %2055 = vpow2.f32 %v952_v8  ;;  %v978_v53 = vmul.f32 1.442695, %v916_v32  ;;  %v855_v54 = vperm.slane %v2849_v44, 1  ;;  %v867_v59 = vperm.slane %v2811_v57, 5 }
 0x214   : > { %2057 = vpow2.f32 %v966_v12  ;;  %v962_v56 = vmul.f32 1.442695, %v908_v33  ;;  %v968_v61 = vmul.f32 1.442695, %v911_v50  ;;  %v856_v6 = vperm.slane %v2849_v44, 2 }
 0x215   : > { %2059 = vpow2.f32 %v954_v51  ;;  %v888_v38 = vsub.f32 %v2662_v31, %v855_v54  ;;  %v913_v10 = vsub.f32 %v2656_v28, %v867_v59  ;;  %v912_v58 = vsub.f32 %v2650_v25, %v867_v59 }
 0x216   : > { %2061 = vpow2.f32 %v956_v13  ;;  %v891_v28 = vsub.f32 %v2688_v43, %v856_v6  ;;  %v914_v25 = vsub.f32 %v2660_v30, %v868_v45  ;;  %v917_v11 = vsub.f32 %v2692_v46, %v869_v18 }
 0x217   : > { %v2825_v4 = vpop.eup %2051  ;;  %2063 = vpow2.f32 %v976_v17  ;;  %v922_v0 = vmul.f32 1.442695, %v888_v38  ;;  %v972_v7 = vmul.f32 1.442695, %v913_v10  ;;  %v970_v8 = vmul.f32 1.442695, %v912_v58 }
 0x218   : > { %v2827_v15 = vpop.eup %2053  ;;  %1084 = vperm.xlu0 %1983, %v2825_v4   ;;  %2065 = vpow2.f32 %v960_v19  ;;  %v928_v47 = vmul.f32 1.442695, %v891_v28  ;;  %v857_v12 = vperm.slane %v2849_v44, 3  ;;  %v974_v51 = vmul.f32 1.442695, %v914_v25 }
 0x219   : > { %v2830_v14 = vpop.eup %2055  ;;  %1063 = vperm.xlu1 %1981, %v2827_v15   ;;  %2067 = vpow2.f32 %v958_v22  ;;  %v854_v63 = vperm.slane %v2849_v44, 0  ;;  %v980_v26 = vmul.f32 1.442695, %v917_v11  ;;  %v859_v16 = vperm.slane %v2849_v44, 5 }
 0x21a   : > { %1066 = vperm.xlu2 %1982, %v2830_v14   ;;  %v2840_v21 = vpop.eup %2057  ;;  %2069 = vpow2.f32 %v978_v53  ;;  %v892_v30 = vsub.f32 %v2711_v55, %v857_v12  ;;  %v889_v32 = vsub.f32 %v2674_v36, %v855_v54  ;;  %v860_v50 = vperm.slane %v2849_v44, 6 }
 0x21b   : > { %v2842_v23 = vpop.eup %2059  ;;  %2071 = vpow2.f32 %v962_v56  ;;  %v886_v46 = vsub.f32 %v2646_v24, %v854_v63  ;;  %v887_v57 = vsub.f32 %v2658_v29, %v854_v63  ;;  %v897_v24 = vsub.f32 %v2664_v1, %v859_v16 }
 0x21c   : > { %v2845_v37 = vpop.eup %2061  ;;  %2073 = vpow2.f32 %v968_v61  ;;  %v930_v45 = vmul.f32 1.442695, %v892_v30  ;;  %v890_v29 = vsub.f32 %v2672_v35, %v856_v6  ;;  %v858_v56 = vperm.slane %v2849_v44, 4 }
 0x21d   : > { %v2856_v60 = vpop.eup %2063  ;;  %2075 = vpow2.f32 %v922_v0  ;;  %v918_v17 = vmul.f32 1.442695, %v886_v46  ;;  %v920_v19 = vmul.f32 1.442695, %v887_v57  ;;  %v940_v33 = vmul.f32 1.442695, %v897_v24 }
 0x21e   : > { %v2858_v40 = vpop.eup %2065  ;;  %2077 = vpow2.f32 %v972_v7  ;;  %v926_v53 = vmul.f32 1.442695, %v890_v29  ;;  %v924_v61 = vmul.f32 1.442695, %v889_v32  ;;  %v898_v35 = vsub.f32 %v2670_v34, %v860_v50 }
 0x21f   : > { %v2861_v62 = vpop.eup %2067  ;;  %2079 = vpow2.f32 %v970_v8  ;;  %v895_v36 = vsub.f32 %v2763_v20, %v858_v56  ;;  %v893_v54 = vsub.f32 %v2705_v52, %v857_v12  ;;  %v896_v34 = vsub.f32 %v2648_v2, %v859_v16 }
 0x220   : > { %1087 = vperm.xlu0 %1983, %v2840_v21   ;;  %v2871_v3 = vpop.eup %2069  ;;  %2081 = vpow2.f32 %v928_v47  ;;  %v942_v10 = vmul.f32 1.442695, %v898_v35  ;;  %v894_v52 = vsub.f32 %v2783_v5, %v858_v56  ;;  %v861_v28 = vperm.slane %v2849_v44, 7 }
 0x221   : > { %1069 = vperm.xlu1 %1981, %v2842_v23   ;;  %v2873_v9 = vpop.eup %2071  ;;  %2083 = vpow2.f32 %v974_v51  ;;  %v936_v58 = vmul.f32 1.442695, %v895_v36  ;;  %v932_v6 = vmul.f32 1.442695, %v893_v54  ;;  %v938_v20 = vmul.f32 1.442695, %v896_v34 }
 0x222   : > { %1072 = vperm.xlu2 %1982, %v2845_v37   ;;  %v2876_v31 = vpop.eup %2073  ;;  %2085 = vpow2.f32 %v980_v26  ;;  %v934_v11 = vmul.f32 1.442695, %v894_v52  ;;  %v901_v2 = vsub.f32 %v2684_v41, %v861_v28  ;;  %v899_v5 = vsub.f32 %v2680_v39, %v860_v50 }
 0x223   : > { %v2887_v13 = vpop.eup %2075  ;;  %2087 = vpow2.f32 %v930_v45  ;;  %v900_v30 = vsub.f32 %v2686_v42, %v861_v28 }
 0x224   : > { %v2889_v43 = vpop.eup %2077  ;;  %2089 = vpow2.f32 %v918_v17  ;;  %v948_v44 = vmul.f32 1.442695, %v901_v2  ;;  %v944_v51 = vmul.f32 1.442695, %v899_v5 }
 0x225   : > { %v2892_v27 = vpop.eup %2079  ;;  %2091 = vpow2.f32 %v920_v19  ;;  %v946_v46 = vmul.f32 1.442695, %v900_v30 }
 0x226   : > { %v2900_v18 = vpop.eup %2081  ;;  %2093 = vpow2.f32 %v940_v33 }
 0x227   : > { %v2902_v22 = vpop.eup %2083  ;;  %2095 = vpow2.f32 %v926_v53 }
 0x228   : > { %1102 = vperm.xlu0 %1983, %v2856_v60   ;;  %v2905_v55 = vpop.eup %2085  ;;  %2097 = vpow2.f32 %v924_v61 }
 0x229   : > { %1078 = vperm.xlu1 %1981, %v2858_v40   ;;  %v2916_v59 = vpop.eup %2087  ;;  %2099 = vpow2.f32 %v942_v10 }
 0x22a   : > { %1075 = vperm.xlu2 %1982, %v2861_v62   ;;  %v2918_v1 = vpop.eup %2089  ;;  %2101 = vpow2.f32 %v936_v58 }
 0x22b   : > { %v2921_v38 = vpop.eup %2091  ;;  %2103 = vpow2.f32 %v932_v6 }
 0x22c   : > { %v2928_v0 = vpop.eup %2093  ;;  %2105 = vpow2.f32 %v938_v20 }
 0x22d   : > { %v2930_v7 = vpop.eup %2095  ;;  %2107 = vpow2.f32 %v934_v11 }
 0x22e   : > { %v2933_v8 = vpop.eup %2097  ;;  %2109 = vpow2.f32 %v948_v44 }
 0x22f   : > { %v2940_v25 = vpop.eup %2099  ;;  %2111 = vpow2.f32 %v944_v51 }
 0x230   : > { %1105 = vperm.xlu0 %1983, %v2871_v3   ;;  %v2942_v47 = vpop.eup %2101  ;;  %2113 = vpow2.f32 %v946_v46 }
 0x231   : > { %1081 = vperm.xlu1 %1981, %v2873_v9   ;;  %v2945_v12 = vpop.eup %2103 }
 0x232   : > { %1090 = vperm.xlu2 %1982, %v2876_v31   ;;  %v2951_v63 = vpop.eup %2105 }
 0x233   : > { %v2953_v26 = vpop.eup %2107 }
 0x234   : > { %v2958_v57 = vpop.eup %2109 }
 0x235   : > { %v2960_v41 = vpop.eup %2111 }
 0x236   : > { %v2964_v39 = vpop.eup %2113 }
 0x238   : > { %1021 = vperm.xlu0 %1983, %v2887_v13  }
 0x239   : > { %1096 = vperm.xlu1 %1981, %v2889_v43  }
 0x23a   : > { %1093 = vperm.xlu2 %1982, %v2892_v27  }
 0x240   : > { %1030 = vperm.xlu0 %1983, %v2900_v18  }
 0x241   : > { %1099 = vperm.xlu1 %1981, %v2902_v22  }
 0x242   : > { %1108 = vperm.xlu2 %1982, %v2905_v55  }
 0x248   : > { %1033 = vperm.xlu0 %1983, %v2916_v59  }
 0x249   : > { %1015 = vperm.xlu1 %1981, %v2918_v1  }
 0x24a   : > { %1018 = vperm.xlu2 %1982, %v2921_v38  }
 0x250   : > { %1048 = vperm.xlu0 %1983, %v2928_v0  }
 0x251   : > { %1027 = vperm.xlu1 %1981, %v2930_v7  }
 0x252   : > { %1024 = vperm.xlu2 %1982, %v2933_v8  }
 0x258   : > { %1051 = vperm.xlu0 %1983, %v2940_v25  }
 0x259   : > { %1042 = vperm.xlu1 %1981, %v2942_v47  }
 0x25a   : > { %1036 = vperm.xlu2 %1982, %v2945_v12  }
 0x261   : > { %1045 = vperm.xlu1 %1981, %v2951_v63  }
 0x262   : > { %1039 = vperm.xlu2 %1982, %v2953_v26  }
 0x269   : > { %1060 = vperm.xlu1 %1981, %v2958_v57  }
 0x26a   : > { %1054 = vperm.xlu2 %1982, %v2960_v41  }
 0x272   : > { %1057 = vperm.xlu2 %1982, %v2964_v39  }
 0x274   : > { %v1067_v45 = vpop.permute.xlu2 %1066 }
 0x275   : > { %v1135_v28 = vperm.slane %v1067_v45, %v2699_v49 }
 0x27c   : > { %v1073_v16 = vpop.permute.xlu2 %1072 }
 0x27d   : > { %v1138_v58 = vperm.slane %v1073_v16, %v2699_v49 }
 0x284   : > { %v1076_v17 = vpop.permute.xlu2 %1075 }
 0x285   : > { %v1140_v20 = vperm.slane %v1076_v17, %v2696_v48 }
 0x28a   : > { %v1085_v19 = vpop.permute.xlu0 %1084 }
 0x28b   : > { %v1064_v24 = vpop.permute.xlu1 %1063  ;;  %v1144_v11 = vperm.slane %v1085_v19, %v2699_v49 }
 0x28c   : > { %v1091_v42 = vpop.permute.xlu2 %1090  ;;  %v1134_v6 = vperm.slane %v1064_v24, %v2696_v48 }
 0x28e   : > { %v1136_v51 = vsel %vm775_vm1, %v1135_v28, %v1134_v6 }
 0x292   : > { %v1088_v29 = vpop.permute.xlu0 %1087 }
 0x293   : > { %v1070_v32 = vpop.permute.xlu1 %1069  ;;  %v1146_v16 = vperm.slane %v1088_v29, %v2696_v48 }
 0x294   : > { %v1094_v33 = vpop.permute.xlu2 %1093  ;;  %v1137_v54 = vperm.slane %v1070_v32, %v2696_v48  ;;  %v1147_v32 = vperm.slane %v1091_v42, %v2699_v49 }
 0x295   : > { %v1149_v17 = vperm.slane %v1094_v33, %v2696_v48 }
 0x296   : > { %v1139_v2 = vsel %vm775_vm1, %v1138_v58, %v1137_v54  ;;  %v1148_v58 = vsel %vm775_vm1, %v1147_v32, %v1146_v16 }
 0x297   : > { %v1165_v24 = vsel %vm822_vm2, %v1139_v2, %v1136_v51 }
 0x29a   : > { %v1103_v50 = vpop.permute.xlu0 %1102 }
 0x29b   : > { %v1079_v53 = vpop.permute.xlu1 %1078  ;;  %v1153_v29 = vperm.slane %v1103_v50, %v2699_v49 }
 0x29c   : > { %v1109_v56 = vpop.permute.xlu2 %1108  ;;  %v1141_v10 = vperm.slane %v1079_v53, %v2699_v49 }
 0x29d   : > { %v1156_v33 = vperm.slane %v1109_v56, %v2699_v49 }
 0x29e   : > { %v1142_v5 = vsel %vm775_vm1, %v1141_v10, %v1140_v20 }
 0x29f   : > { %v1166_v45 = vsel %vm824_vm3, %v1142_v5, %v1165_v24 }
 0x2a2   : > { %v1106_v35 = vpop.permute.xlu0 %1105 }
 0x2a3   : > { %v1082_v61 = vpop.permute.xlu1 %1081 }
 0x2a4   : > { %v1019_v36 = vpop.permute.xlu2 %1018  ;;  %v1143_v34 = vperm.slane %v1082_v61, %v2696_v48  ;;  %v1155_v61 = vperm.slane %v1106_v35, %v2696_v48 }
 0x2a5   : > { %v1111_v32 = vperm.slane %v1019_v36, %v2699_v49 }
 0x2a6   : > { %v1145_v30 = vsel %vm775_vm1, %v1144_v11, %v1143_v34  ;;  %v1157_v20 = vsel %vm775_vm1, %v1156_v33, %v1155_v61 }
 0x2a7   : > { %v1167_v53 = vsel %vm826_vm4, %v1145_v30, %v1166_v45 }
 0x2a8   : > { %v1168_v34 = vsel %vm828_vm5, %v1148_v58, %v1167_v53 }
 0x2aa   : > { %v1022_v44 = vpop.permute.xlu0 %1021 }
 0x2ab   : > { %v1097_v52 = vpop.permute.xlu1 %1096  ;;  %v1113_v53 = vperm.slane %v1022_v44, %v2696_v48 }
 0x2ac   : > { %v1150_v46 = vperm.slane %v1097_v52, %v2699_v49  ;;  %v1025_v19 = vpop.permute.xlu2 %1024 }
 0x2ad   : > { %v1114_v61 = vperm.slane %v1025_v19, %v2699_v49 }
 0x2ae   : > { %v1151_v54 = vsel %vm775_vm1, %v1150_v46, %v1149_v17 }
 0x2af   : > { %v1169_v42 = vsel %vm830_vm6, %v1151_v54, %v1168_v34  ;;  %v1115_v33 = vsel %vm775_vm1, %v1114_v61, %v1113_v53 }
 0x2b2   : > { %v1031_v28 = vpop.permute.xlu0 %1030 }
 0x2b3   : > { %v1100_v10 = vpop.permute.xlu1 %1099  ;;  %v1117_v54 = vperm.slane %v1031_v28, %v2699_v49 }
 0x2b4   : > { %v1152_v6 = vperm.slane %v1100_v10, %v2696_v48  ;;  %v1037_v50 = vpop.permute.xlu2 %1036 }
 0x2b5   : > { %v1120_v19 = vperm.slane %v1037_v50, %v2699_v49 }
 0x2b6   : > { %v1154_v52 = vsel %vm775_vm1, %v1153_v29, %v1152_v6 }
 0x2b7   : > { %v1170_v35 = vsel %vm832_vm7, %v1154_v52, %v1169_v42 }
 0x2b8   : > { %v1171_v11 = vsel %vm834_vm8, %v1157_v20, %v1170_v35 }
 0x2b9   : > { %v1177_v2 = vsel %vm845_vm9, %v1171_v11, 0.0 }
 0x2ba   : > { %1178 = vadd.xlane.f32.xlu0 %v1177_v2  ;;  %v1034_v51 = vpop.permute.xlu0 %1033 }
 0x2bb   : > { %v1016_v5 = vpop.permute.xlu1 %1015  ;;  %v1119_v34 = vperm.slane %v1034_v51, %v2696_v48 }
 0x2bc   : > { %v1040_v30 = vpop.permute.xlu2 %1039  ;;  %v1110_v24 = vperm.slane %v1016_v5, %v2696_v48 }
 0x2bd   : > { %v1122_v36 = vperm.slane %v1040_v30, %v2696_v48  ;;  %v1121_v11 = vsel %vm775_vm1, %v1120_v19, %v1119_v34 }
 0x2be   : > { %v1112_v10 = vsel %vm775_vm1, %v1111_v32, %v1110_v24 }
 0x2bf   : > { %v1158_v44 = vsel %vm822_vm2, %v1115_v33, %v1112_v10 }
 0x2c2   : > { %v1049_v16 = vpop.permute.xlu0 %1048 }
 0x2c3   : > { %v1028_v56 = vpop.permute.xlu1 %1027  ;;  %v1126_v42 = vperm.slane %v1049_v16, %v2699_v49 }
 0x2c4   : > { %v1055_v17 = vpop.permute.xlu2 %1054  ;;  %v1116_v45 = vperm.slane %v1028_v56, %v2696_v48 }
 0x2c5   : > { %v1129_v50 = vperm.slane %v1055_v17, %v2699_v49 }
 0x2c6   : > { %v1118_v58 = vsel %vm775_vm1, %v1117_v54, %v1116_v45 }
 0x2c7   : > { %v1159_v20 = vsel %vm824_vm3, %v1118_v58, %v1158_v44 }
 0x2c8   : > { %v1160_v56 = vsel %vm826_vm4, %v1121_v11, %v1159_v20 }
 0x2ca   : > { %v1052_v35 = vpop.permute.xlu0 %1051 }
 0x2cb   : > { %v1043_v46 = vpop.permute.xlu1 %1042  ;;  %v1128_v5 = vperm.slane %v1052_v35, %v2696_v48 }
 0x2cc   : > { %v1123_v29 = vperm.slane %v1043_v46, %v2699_v49  ;;  %v1058_v51 = vpop.permute.xlu2 %1057 }
 0x2cd   : > { %v1131_v24 = vperm.slane %v1058_v51, %v2696_v48  ;;  %v1130_v32 = vsel %vm775_vm1, %v1129_v50, %v1128_v5 }
 0x2ce   : > { %v1124_v28 = vsel %vm775_vm1, %v1123_v29, %v1122_v36 }
 0x2cf   : > { %v1161_v30 = vsel %vm828_vm5, %v1124_v28, %v1160_v56 }
 0x2d3   : > { %v1046_v6 = vpop.permute.xlu1 %1045 }
 0x2d4   : > { %v1125_v52 = vperm.slane %v1046_v6, %v2696_v48 }
 0x2d6   : > { %v1127_v2 = vsel %vm775_vm1, %v1126_v42, %v1125_v52 }
 0x2d7   : > { %v1162_v16 = vsel %vm830_vm6, %v1127_v2, %v1161_v30 }
 0x2d8   : > { %v1163_v61 = vsel %vm832_vm7, %v1130_v32, %v1162_v16 }
 0x2db   : > { %v1061_v46 = vpop.permute.xlu1 %1060 }
 0x2dc   : > { %v1132_v45 = vperm.slane %v1061_v46, %v2699_v49 }
 0x2de   : > { %v1133_v53 = vsel %vm775_vm1, %v1132_v45, %v1131_v24 }
 0x2df   : > { %v1164_v54 = vsel %vm834_vm8, %v1133_v53, %v1163_v61 }
 0x2e0   : > { %v1174_v10 = vsel %vm845_vm9, %v1164_v54, 0.0 }
 0x2e1   : > { %1175 = vadd.xlane.f32.xlu1 %v1174_v10 }
 0x32d   : > { %v1179_v58 = vpop.xlane.xlu0 %1178 }
 0x32e   : > { %2115 = vrcp.f32 %v1179_v58 }
 0x334   : > { %v3031_v17 = vpop.eup %2115 }
 0x335   : > { %v1193_v29 = vperm.slane %v3031_v17, 1  ;;  %v1192_v6 = vperm.slane %v3031_v17, 0  ;;  %v1194_v33 = vperm.slane %v3031_v17, 2  ;;  %v1195_v56 = vperm.slane %v3031_v17, 3 }
 0x336   : > { %v1197_v32 = vperm.slane %v3031_v17, 5 }
 0x337   : > { %v1235_v34 = vmul.f32 %v2845_v37, %v1193_v29  ;;  %v1232_v52 = vmul.f32 %v2827_v15, %v1192_v6  ;;  %v1233_v36 = vmul.f32 %v2830_v14, %v1192_v6  ;;  %v1237_v44 = vmul.f32 %v2858_v40, %v1194_v33 }
 0x338   : > { %v1234_v35 = vmul.f32 %v2842_v23, %v1193_v29  ;;  %v1236_v28 = vmul.f32 %v2861_v62, %v1194_v33  ;;  %v1196_v40 = vperm.slane %v3031_v17, 4  ;;  %v1238_v62 = vmul.f32 %v2873_v9, %v1195_v56 }
 0x339   : > { %v1267_v19 = vpack.c.bf16 %v1235_v34, %v1235_v34  ;;  %v1264_v42 = vpack.c.bf16 %v1232_v52, %v1232_v52  ;;  %v1265_v20 = vpack.c.bf16 %v1233_v36, %v1233_v36  ;;  %v1269_v51 = vpack.c.bf16 %v1237_v44, %v1237_v44 }
 0x33a   : > { %v1266_v50 = vpack.c.bf16 %v1234_v35, %v1234_v35  ;;  %v1268_v14 = vpack.c.bf16 %v1236_v28, %v1236_v28  ;;  %v1239_v16 = vmul.f32 %v2825_v4, %v1195_v56  ;;  %v1241_v45 = vmul.f32 %v2876_v31, %v1196_v40 }
 0x33b   : > { %v1333_v11 = vunpack.c.l.b16 %v1267_v19  ;;  %v1330_v2 = vunpack.c.l.b16 %v1264_v42  ;;  %v1331_v5 = vunpack.c.l.b16 %v1265_v20  ;;  %v1335_v46 = vunpack.c.l.b16 %v1269_v51 }
 0x33c   : > { %v1332_v23 = vunpack.c.l.b16 %v1266_v50  ;;  %v1334_v24 = vunpack.c.l.b16 %v1268_v14  ;;  %v1270_v54 = vpack.c.bf16 %v1238_v62, %v1238_v62  ;;  %v1271_v10 = vpack.c.bf16 %v1239_v16, %v1239_v16 }
 0x33d   : > { %v1844_v37 = vunpack.i.l.s16 %v1333_v11  ;;  %v1841_v30 = vunpack.i.l.s16 %v1330_v2  ;;  %v1842_v15 = vunpack.i.l.s16 %v1331_v5  ;;  %v1846_v53 = vunpack.i.l.s16 %v1335_v46 }
 0x33e   : > { %v1843_v61 = vunpack.i.l.s16 %v1332_v23  ;;  %v1845_v58 = vunpack.i.l.s16 %v1334_v24  ;;  %v1273_v29 = vpack.c.bf16 %v1241_v45, %v1241_v45  ;;  %v1336_v6 = vunpack.c.l.b16 %v1270_v54 }
 0x33f   : > { %1452 = vperm.xlu0 %1983, %v1844_v37   ;;  %1443 = vperm.xlu2 %1982, %v1841_v30   ;;  %v1337_v33 = vunpack.c.l.b16 %v1271_v10  ;;  %v1243_v9 = vmul.f32 %v2889_v43, %v1197_v32  ;;  %v1240_v4 = vmul.f32 %v2840_v21, %v1196_v40  ;;  %v1242_v31 = vmul.f32 %v2892_v27, %v1197_v32 }
 0x340   : > { %1446 = vperm.xlu1 %1981, %v1842_v15   ;;  %v1339_v34 = vunpack.c.l.b16 %v1273_v29  ;;  %v1198_v52 = vperm.slane %v3031_v17, 6  ;;  %v1847_v36 = vunpack.i.l.s16 %v1336_v6 }
 0x341   : > { %v1848_v44 = vunpack.i.l.s16 %v1337_v33  ;;  %v1275_v19 = vpack.c.bf16 %v1243_v9, %v1243_v9  ;;  %v1272_v42 = vpack.c.bf16 %v1240_v4, %v1240_v4  ;;  %v1274_v35 = vpack.c.bf16 %v1242_v31, %v1242_v31 }
 0x342   : > { %v1850_v20 = vunpack.i.l.s16 %v1339_v34  ;;  %v1244_v28 = vmul.f32 %v2902_v22, %v1198_v52  ;;  %v1245_v21 = vmul.f32 %v2856_v60, %v1198_v52 }
 0x343   : > { %v1341_v11 = vunpack.c.l.b16 %v1275_v19  ;;  %v1338_v43 = vunpack.c.l.b16 %v1272_v42  ;;  %v1340_v2 = vunpack.c.l.b16 %v1274_v35 }
 0x344   : > { %v1276_v27 = vpack.c.bf16 %v1244_v28, %v1244_v28  ;;  %v1277_v37 = vpack.c.bf16 %v1245_v21, %v1245_v21 }
 0x345   : > { %v1852_v51 = vunpack.i.l.s16 %v1341_v11  ;;  %v1849_v56 = vunpack.i.l.s16 %v1338_v43  ;;  %v1851_v30 = vunpack.i.l.s16 %v1340_v2 }
 0x346   : > { %v1342_v15 = vunpack.c.l.b16 %v1276_v27  ;;  %v1343_v50 = vunpack.c.l.b16 %v1277_v37 }
 0x347   : > { %1458 = vperm.xlu0 %1983, %v1846_v53   ;;  %1449 = vperm.xlu2 %1982, %v1843_v61  }
 0x348   : > { %1455 = vperm.xlu1 %1981, %v1845_v58   ;;  %v1853_v46 = vunpack.i.l.s16 %v1342_v15  ;;  %v1854_v23 = vunpack.i.l.s16 %v1343_v50 }
 0x34f   : > { %1461 = vperm.xlu0 %1983, %v1847_v36   ;;  %1464 = vperm.xlu2 %1982, %v1848_v44  }
 0x350   : > { %1470 = vperm.xlu1 %1981, %v1850_v20  }
 0x354   : > { %v1176_v5 = vpop.xlane.xlu1 %1175 }
 0x355   : > { %2117 = vrcp.f32 %v1176_v5 }
 0x357   : > { %1476 = vperm.xlu0 %1983, %v1852_v51   ;;  %1467 = vperm.xlu2 %1982, %v1849_v56  }
 0x358   : > { %1473 = vperm.xlu1 %1981, %v1851_v30  }
 0x35b   : > { %v3054_v14 = vpop.eup %2117 }
 0x35c   : > { %v1187_v22 = vperm.slane %v3054_v14, 3  ;;  %v1188_v40 = vperm.slane %v3054_v14, 4  ;;  %v1184_v60 = vperm.slane %v3054_v14, 0  ;;  %v1189_v62 = vperm.slane %v3054_v14, 5 }
 0x35d   : > { %v1191_v52 = vperm.slane %v3054_v14, 7  ;;  %v1186_v50 = vperm.slane %v3054_v14, 2 }
 0x35e   : > { %v1223_v16 = vmul.f32 %v2945_v12, %v1187_v22  ;;  %v1225_v24 = vmul.f32 %v2942_v47, %v1188_v40  ;;  %v1216_v45 = vmul.f32 %v2918_v1, %v1184_v60  ;;  %v1224_v54 = vmul.f32 %v2953_v26, %v1188_v40 }
 0x35f   : > { %1479 = vperm.xlu0 %1983, %v1853_v46   ;;  %1482 = vperm.xlu2 %1982, %v1854_v23   ;;  %v1226_v10 = vmul.f32 %v2951_v63, %v1189_v62  ;;  %v1217_v58 = vmul.f32 %v2921_v38, %v1184_v60  ;;  %v1190_v47 = vperm.slane %v3054_v14, 6  ;;  %v1185_v26 = vperm.slane %v3054_v14, 1 }
 0x360   : > { %v1255_v32 = vpack.c.bf16 %v1223_v16, %v1223_v16  ;;  %v1257_v53 = vpack.c.bf16 %v1225_v24, %v1225_v24  ;;  %v1248_v61 = vpack.c.bf16 %v1216_v45, %v1216_v45  ;;  %v1256_v4 = vpack.c.bf16 %v1224_v54, %v1224_v54 }
 0x361   : > { %v1258_v34 = vpack.c.bf16 %v1226_v10, %v1226_v10  ;;  %v1249_v31 = vpack.c.bf16 %v1217_v58, %v1217_v58  ;;  %v1229_v38 = vmul.f32 %v2960_v41, %v1190_v47  ;;  %v1231_v19 = vmul.f32 %v2958_v57, %v1191_v52 }
 0x362   : > { %v1321_v29 = vunpack.c.l.b16 %v1255_v32  ;;  %v1323_v6 = vunpack.c.l.b16 %v1257_v53  ;;  %v1314_v12 = vunpack.c.l.b16 %v1248_v61  ;;  %v1322_v63 = vunpack.c.l.b16 %v1256_v4 }
 0x363   : > { %v1324_v36 = vunpack.c.l.b16 %v1258_v34  ;;  %v1315_v44 = vunpack.c.l.b16 %v1249_v31  ;;  %v1218_v42 = vmul.f32 %v2887_v13, %v1185_v26  ;;  %v1261_v35 = vpack.c.bf16 %v1229_v38, %v1229_v38  ;;  %v3096_v38 = vld [vmem:[%s2488_s15] sm:$0xff] }
 0x364   : > { %v1832_v33 = vunpack.i.l.s16 %v1321_v29  ;;  %v1834_v1 = vunpack.i.l.s16 %v1323_v6  ;;  %v1825_v9 = vunpack.i.l.s16 %v1314_v12  ;;  %v1833_v20 = vunpack.i.l.s16 %v1322_v63 }
 0x365   : > { %v1835_v28 = vunpack.i.l.s16 %v1324_v36  ;;  %v1826_v11 = vunpack.i.l.s16 %v1315_v44  ;;  %v1263_v43 = vpack.c.bf16 %v1231_v19, %v1231_v19  ;;  %v1250_v21 = vpack.c.bf16 %v1218_v42, %v1218_v42  ;;  %v3101_v36 = vld [vmem:[%s2488_s15 + $0x8] sm:$0xff]  ;;  %s1683_s15 = sshll.u32 %s1680_s21, 4  ;;  %s1684_s15 = int_to_ptr.hbm [resolvable:$true] %s1683_s15 }
 0x366   : > { %1416 = vperm.xlu1 %1981, %v1832_v33   ;;  %v1327_v2 = vunpack.c.l.b16 %v1261_v35  ;;  %v1230_v5 = vmul.f32 %v2964_v39, %v1191_v52  ;;  %v1219_v51 = vmul.f32 %v2933_v8, %v1185_v26  ;;  %v1199_v13 = vperm.slane %v3031_v17, 7  ;;  %s2259_s30 = sshra.s32 %s1684_s15, 4  ;;  %s2260_s30 = int_to_ptr.hbm [resolvable:$true] %s2259_s30 }
 0x367   : > { %1422 = vperm.xlu0 %1983, %v1834_v1   ;;  %1395 = vperm.xlu2 %1982, %v1825_v9   ;;  %v1329_v27 = vunpack.c.l.b16 %v1263_v43  ;;  %v1316_v41 = vunpack.c.l.b16 %v1250_v21  ;;  %v1220_v46 = vmul.f32 %v2930_v7, %v1186_v50  ;;  %v1221_v32 = vmul.f32 %v2900_v18, %v1186_v50  ;;  %s2261_s12 = scalar_lea.hbm %s2260_s30, 16  ;;  %p2266_p11 = scmp.lt.s32.totalorder %s2260_s30, %s3217_s7 }
 0x368   : > { %v1838_v56 = vunpack.i.l.s16 %v1327_v2  ;;  %v1262_v57 = vpack.c.bf16 %v1230_v5, %v1230_v5  ;;  %v1251_v15 = vpack.c.bf16 %v1219_v51, %v1219_v51  ;;  %v1247_v60 = vmul.f32 %v2905_v55, %v1199_v13  ;;  %p2262_p1 = scmp.ne.s32.totalorder %s2260_s30, %s2261_s12  ;;  %p2267_p9 = scmp.lt.s32.totalorder %s2265_s10, %s2261_s12 }
 0x369   : > { %v1840_v37 = vunpack.i.l.s16 %v1329_v27  ;;  %v1827_v30 = vunpack.i.l.s16 %v1316_v41  ;;  %v1252_v24 = vpack.c.bf16 %v1220_v46, %v1220_v46  ;;  %v1253_v54 = vpack.c.bf16 %v1221_v32, %v1221_v32 }
 0x36a   : > { %v1328_v40 = vunpack.c.l.b16 %v1262_v57  ;;  %v1317_v39 = vunpack.c.l.b16 %v1251_v15  ;;  %v1279_v8 = vpack.c.bf16 %v1247_v60, %v1247_v60  ;;  %v1222_v55 = vmul.f32 %v2916_v59, %v1187_v22  ;;  %p2263_p4 = pnand %p2262_p1, %p2454_p7  ;;  %p2268_p2 = por %p2267_p9, %p2266_p11 }
 0x36b   : > { %v1318_v45 = vunpack.c.l.b16 %v1252_v24  ;;  %v1319_v10 = vunpack.c.l.b16 %v1253_v54  ;;  %v1227_v6 = vmul.f32 %v2928_v0, %v1189_v62  ;;  %v1228_v9 = vmul.f32 %v2940_v25, %v1190_v47 }
 0x36c   : > { %v1839_v23 = vunpack.i.l.s16 %v1328_v40  ;;  %v1828_v16 = vunpack.i.l.s16 %v1317_v39  ;;  %v1345_v17 = vunpack.c.l.b16 %v1279_v8  ;;  %v1254_v58 = vpack.c.bf16 %v1222_v55, %v1222_v55  ;;  %p2264_p8 = pneg %p2263_p4 }
 0x36d   : > { %v1829_v61 = vunpack.i.l.s16 %v1318_v45  ;;  %v1830_v7 = vunpack.i.l.s16 %v1319_v10  ;;  %v1259_v18 = vpack.c.bf16 %v1227_v6, %v1227_v6  ;;  %v1260_v22 = vpack.c.bf16 %v1228_v9, %v1228_v9 }
 0x36e   : > { %1419 = vperm.xlu1 %1981, %v1833_v20   ;;  %v1856_v53 = vunpack.i.l.s16 %v1345_v17  ;;  %v1320_v29 = vunpack.c.l.b16 %v1254_v58  ;;  %v1246_v31 = vmul.f32 %v2871_v3, %v1199_v13  ;;  %v1280_v14 = vpack.c.bf16 %v3096_v38, %v3096_v38  ;;  %p2269_p10 = pnand %p2268_p2, %p2264_p8 }
 0x36f   : > { %1425 = vperm.xlu0 %1983, %v1835_v28   ;;  %1398 = vperm.xlu2 %1982, %v1826_v11   ;;  %v1325_v1 = vunpack.c.l.b16 %v1259_v18  ;;  %v1326_v34 = vunpack.c.l.b16 %v1260_v22  ;;  %v1281_v25 = vpack.c.bf16 %v3101_v36, %v3101_v36  ;;  %v1889_v22 = vld [vmem:[#allocation8 + $0x8] sm:$0xff] }
 0x370   : > { %v1831_v12 = vunpack.i.l.s16 %v1320_v29  ;;  %v1278_v0 = vpack.c.bf16 %v1246_v31, %v1246_v31  ;;  %v1555_v47 = vunpack.c.l.b16 %v1280_v14  ;;  %1607 = vmatpush.bf16.msrb.mxu2 %v1889_v22  ;;  %v1888_v31 = vld [vmem:[#allocation8] sm:$0xff] }
 0x371   : > { %v1836_v59 = vunpack.i.l.s16 %v1325_v1  ;;  %v1837_v52 = vunpack.i.l.s16 %v1326_v34  ;;  %v1556_v44 = vunpack.c.l.b16 %v1281_v25 }
 0x372   : > { %v1344_v26 = vunpack.c.l.b16 %v1278_v0 }
 0x373   : > { %v1557_v28 = vpack.c.b16 %v1556_v44, %v1555_v47 }
 0x374   : > { %v1855_v63 = vunpack.i.l.s16 %v1344_v26  ;;  %1608 = vmatpush.bf16.msrb.mxu2 %v1888_v31 }
 0x375   : > { %1569 = vmatpush.bf16.msrb.mxu1 %v1557_v28 }
 0x376   : > { %1434 = vperm.xlu1 %1981, %v1838_v56  }
 0x377   : > { %1440 = vperm.xlu0 %1983, %v1840_v37   ;;  %1401 = vperm.xlu2 %1982, %v1827_v30  }
 0x37e   : > { %1437 = vperm.xlu1 %1981, %v1839_v23  }
 0x37f   : > { %1404 = vperm.xlu2 %1982, %v1828_v16  }
 0x386   : > { %1488 = vperm.xlu1 %1981, %v1856_v53  }
 0x387   : > { %1407 = vperm.xlu2 %1982, %v1829_v61  }
 0x38f   : > { %1410 = vperm.xlu2 %1982, %v1830_v7  }
 0x397   : > { %1413 = vperm.xlu2 %1982, %v1831_v12  }
 0x399   : > { %v1444_v33 = vpop.permute.xlu2 %1443 }
 0x39a   : > { %v1514_v11 = vperm.slane %v1444_v33, %v2696_v48 }
 0x39f   : > { %1428 = vperm.xlu2 %1982, %v1836_v59  }
 0x3a1   : > { %v1450_v4 = vpop.permute.xlu2 %1449 }
 0x3a2   : > { %v1517_v42 = vperm.slane %v1450_v4, %v2696_v48  ;;  %v1887_v4 = vld [vmem:[#allocation7 + $0x8] sm:$0xff] }
 0x3a3   : > { %1636 = vmatpush.bf16.msrb.mxu3 %v1887_v4 }
 0x3a7   : > { %1431 = vperm.xlu2 %1982, %v1837_v52   ;;  %v1886_v52 = vld [vmem:[#allocation7] sm:$0xff] }
 0x3a8   : > { %1637 = vmatpush.bf16.msrb.mxu3 %v1886_v52 }
 0x3a9   : > { %v1465_v62 = vpop.permute.xlu2 %1464 }
 0x3aa   : > { %v1524_v15 = vperm.slane %v1465_v62, %v2699_v49 }
 0x3af   : > { %1485 = vperm.xlu2 %1982, %v1855_v63  }
 0x3b1   : > { %v1453_v3 = vpop.permute.xlu0 %1452  ;;  %v1468_v19 = vpop.permute.xlu2 %1467 }
 0x3b2   : > { %v1518_v20 = vperm.slane %v1453_v3, %v2699_v49  ;;  %v1447_v35 = vpop.permute.xlu1 %1446  ;;  %v1526_v60 = vperm.slane %v1468_v19, %v2696_v48 }
 0x3b3   : > { %v1515_v43 = vperm.slane %v1447_v35, %v2699_v49 }
 0x3b4   : > { %v1519_v21 = vsel %vm775_vm1, %v1518_v20, %v1517_v42 }
 0x3b5   : > { %v1516_v2 = vsel %vm775_vm1, %v1515_v43, %v1514_v11 }
 0x3b6   : > { %v1545_v5 = vsel %vm822_vm2, %v1519_v21, %v1516_v2 }
 0x3b9   : > { %v1459_v27 = vpop.permute.xlu0 %1458  ;;  %v1483_v41 = vpop.permute.xlu2 %1482 }
 0x3ba   : > { %v1456_v51 = vpop.permute.xlu1 %1455  ;;  %v1521_v56 = vperm.slane %v1459_v27, %v2699_v49  ;;  %v1533_v7 = vperm.slane %v1483_v41, %v2699_v49 }
 0x3bb   : > { %v1520_v57 = vperm.slane %v1456_v51, %v2696_v48 }
 0x3bd   : > { %v1522_v13 = vsel %vm775_vm1, %v1521_v56, %v1520_v57 }
 0x3be   : > { %v1546_v46 = vsel %vm824_vm3, %v1522_v13, %v1545_v5 }
 0x3c1   : > { %v1462_v37 = vpop.permute.xlu0 %1461  ;;  %v1396_v30 = vpop.permute.xlu2 %1395 }
 0x3c2   : > { %v1523_v50 = vperm.slane %v1462_v37, %v2696_v48  ;;  %v1471_v40 = vpop.permute.xlu1 %1470  ;;  %v1490_v20 = vperm.slane %v1396_v30, %v2696_v48 }
 0x3c3   : > { %v1527_v39 = vperm.slane %v1471_v40, %v2699_v49 }
 0x3c4   : > { %v1525_v23 = vsel %vm775_vm1, %v1524_v15, %v1523_v50 }
 0x3c5   : > { %v1547_v8 = vsel %vm826_vm4, %v1525_v23, %v1546_v46  ;;  %v1528_v16 = vsel %vm775_vm1, %v1527_v39, %v1526_v60 }
 0x3c6   : > { %v1548_v24 = vsel %vm828_vm5, %v1528_v16, %v1547_v8 }
 0x3c9   : > { %v1477_v17 = vpop.permute.xlu0 %1476  ;;  %v1399_v45 = vpop.permute.xlu2 %1398 }
 0x3ca   : > { %v1474_v32 = vpop.permute.xlu1 %1473  ;;  %v1530_v53 = vperm.slane %v1477_v17, %v2699_v49  ;;  %v1491_v44 = vperm.slane %v1399_v45, %v2699_v49 }
 0x3cb   : > { %v1529_v61 = vperm.slane %v1474_v32, %v2696_v48 }
 0x3cc   : > { %v1492_v21 = vsel %vm775_vm1, %v1491_v44, %v1490_v20 }
 0x3cd   : > { %v1531_v54 = vsel %vm775_vm1, %v1530_v53, %v1529_v61 }
 0x3ce   : > { %v1549_v29 = vsel %vm830_vm6, %v1531_v54, %v1548_v24 }
 0x3d1   : > { %v1480_v10 = vpop.permute.xlu0 %1479  ;;  %v1402_v55 = vpop.permute.xlu2 %1401 }
 0x3d2   : > { %v1532_v58 = vperm.slane %v1480_v10, %v2696_v48  ;;  %v1493_v3 = vperm.slane %v1402_v55, %v2696_v48 }
 0x3d4   : > { %v1534_v6 = vsel %vm775_vm1, %v1533_v7, %v1532_v58  ;;  %v1581_v7 = vpack.c.bf16 %v3101_v36, %v3096_v38 }
 0x3d5   : > { %v1550_v12 = vsel %vm832_vm7, %v1534_v6, %v1549_v29  ;;  %v1986_v6 = vld [vmem:[%s3216_s6] ss:$0 sm:$0xff] }
 0x3d6   : > { %1866 = vmatmul.msk.bf16.vlgmr.msrb.gmra.mxu2 %vm468_vm0, %v1581_v7 }
 0x3d8   : > { %v1417_v33 = vpop.permute.xlu1 %1416 }
 0x3d9   : > { %v1405_v18 = vpop.permute.xlu2 %1404  ;;  %v1423_v0 = vpop.permute.xlu0 %1422  ;;  %v1500_v35 = vperm.slane %v1417_v33, %v2699_v49 }
 0x3da   : > { %v1494_v63 = vperm.slane %v1405_v18, %v2699_v49  ;;  %v1503_v13 = vperm.slane %v1423_v0, %v2699_v49 }
 0x3dc   : > { %v1495_v28 = vsel %vm775_vm1, %v1494_v63, %v1493_v3 }
 0x3dd   : > { %v1538_v27 = vsel %vm822_vm2, %v1495_v28, %v1492_v21 }
 0x3e0   : > { %v1420_v9 = vpop.permute.xlu1 %1419 }
 0x3e1   : > { %v1408_v1 = vpop.permute.xlu2 %1407  ;;  %v1426_v14 = vpop.permute.xlu0 %1425  ;;  %v1502_v41 = vperm.slane %v1420_v9, %v2696_v48 }
 0x3e2   : > { %v1496_v42 = vperm.slane %v1408_v1, %v2696_v48  ;;  %v1505_v56 = vperm.slane %v1426_v14, %v2696_v48 }
 0x3e3   : > { %v1504_v50 = vsel %vm775_vm1, %v1503_v13, %v1502_v41 }
 0x3e8   : > { %v1435_v62 = vpop.permute.xlu1 %1434 }
 0x3e9   : > { %v1411_v59 = vpop.permute.xlu2 %1410  ;;  %v1509_v37 = vperm.slane %v1435_v62, %v2699_v49  ;;  %v1441_v40 = vpop.permute.xlu0 %1440 }
 0x3ea   : > { %v1497_v25 = vperm.slane %v1411_v59, %v2699_v49  ;;  %v1512_v24 = vperm.slane %v1441_v40, %v2699_v49 }
 0x3ec   : > { %v1498_v11 = vsel %vm775_vm1, %v1497_v25, %v1496_v42 }
 0x3ed   : > { %v1539_v57 = vsel %vm824_vm3, %v1498_v11, %v1538_v27 }
 0x3f0   : > { %v1438_v47 = vpop.permute.xlu1 %1437 }
 0x3f1   : > { %v1414_v34 = vpop.permute.xlu2 %1413  ;;  %v1511_v46 = vperm.slane %v1438_v47, %v2696_v48 }
 0x3f2   : > { %v1499_v19 = vperm.slane %v1414_v34, %v2696_v48 }
 0x3f3   : > { %v1513_v53 = vsel %vm775_vm1, %v1512_v24, %v1511_v46 }
 0x3f4   : > { %v1501_v2 = vsel %vm775_vm1, %v1500_v35, %v1499_v19 }
 0x3f5   : > { %v1540_v30 = vsel %vm826_vm4, %v1501_v2, %v1539_v57 }
 0x3f6   : > { %v1541_v23 = vsel %vm828_vm5, %v1504_v50, %v1540_v30 }
 0x3f8   : > { %v1489_v60 = vpop.permute.xlu1 %1488 }
 0x3f9   : > { %v1429_v26 = vpop.permute.xlu2 %1428  ;;  %v1536_v17 = vperm.slane %v1489_v60, %v2699_v49 }
 0x3fa   : > { %v1506_v5 = vperm.slane %v1429_v26, %v2699_v49 }
 0x3fc   : > { %v1507_v15 = vsel %vm775_vm1, %v1506_v5, %v1505_v56 }
 0x3fd   : > { %v1542_v8 = vsel %vm830_vm6, %v1507_v15, %v1541_v23 }
 0x401   : > { %v1432_v43 = vpop.permute.xlu2 %1431 }
 0x402   : > { %v1508_v51 = vperm.slane %v1432_v43, %v2696_v48 }
 0x404   : > { %v1510_v39 = vsel %vm775_vm1, %v1509_v37, %v1508_v51 }
 0x405   : > { %v1543_v45 = vsel %vm832_vm7, %v1510_v39, %v1542_v8 }
 0x406   : > { %v1544_v10 = vsel %vm834_vm8, %v1513_v53, %v1543_v45 }
 0x409   : > { %v1486_v16 = vpop.permute.xlu2 %1485 }
 0x40a   : > { %v1535_v32 = vperm.slane %v1486_v16, %v2696_v48 }
 0x40c   : > { %v1537_v61 = vsel %vm775_vm1, %v1536_v17, %v1535_v32 }
 0x40d   : > { %v1551_v54 = vsel %vm834_vm8, %v1537_v61, %v1550_v12 }
 0x40e   : > { %v1552_v55 = vpack.c.b16 %v1551_v54, %v1544_v10 }
 0x410   : > { %1857 = vmatmul.msk.bf16.vlgmr.msrb.gmra.mxu1 %vm845_vm9, %v1552_v55 }
 0x459   : > { %v1610_v48 = vpop.f32.mrf.mxu2 }
 0x461   : > { %v1612_v59 = vpop.f32.mrf.mxu2 }
 0x48d   : > { %v1571_v49 = vpop.f32.mrf.mxu1 }
 0x495   : > { %v1573_v58 = vpop.f32.mrf.mxu1 }
 0x496   : > { %v1576_v29 = vpack.c.bf16 %v1573_v58, %v1571_v49 }
 0x498   : > { %1875 = vmatmul.msk.bf16.vlgmr.msrb.gmra.mxu3 %vm468_vm0, %v1576_v29 }
 0x51b   : > { %v1639_v12 = vpop.f32.mrf.mxu3 }
 0x51c   : > { %v1640_v18 = vadd.f32 %v1639_v12, %v1610_v48 }
 0x51e   : > { %v1648_v33 = vadd.f32 %v1986_v6, %v1640_v18 }
 0x520   : > { %v1652_v1 = vmin.f32 %v1648_v33, 0.0  ;;  %vm1650_vm10 = vcmp.gt.f32.partialorder %v1648_v33, 0.0 }
 0x522   : > { %v1654_v9 = vmul.f32 1.442695, %v1652_v1 }
 0x523   : > { %v1641_v38 = vpop.f32.mrf.mxu3 }
 0x524   : > { %2119 = vpow2.f32 %v1654_v9  ;;  %v1642_v36 = vadd.f32 %v1641_v38, %v1612_v59 }
 0x526   : > { %v1649_v22 = vadd.f32 %v1986_v6, %v1642_v36 }
 0x528   : > { %v1653_v4 = vmin.f32 %v1649_v22, 0.0  ;;  %vm1651_vm11 = vcmp.gt.f32.partialorder %v1649_v22, 0.0 }
 0x52a   : > { %v2120_v34 = vpop.eup %2119  ;;  %v1656_v31 = vmul.f32 1.442695, %v1653_v4 }
 0x52b   : > { %v1876_v52 = vadd.f32 -1.0, %v2120_v34 }
 0x52c   : > { %2121 = vpow2.f32 %v1656_v31 }
 0x52d   : > { %v1660_v0 = vmul.f32 1.6732632, %v1876_v52 }
 0x52f   : > { %v1662_v62 = vsel %vm1650_vm10, %v1648_v33, %v1660_v0 }
 0x530   : > { %v1664_v26 = vmul.f32 1.050701, %v1662_v62 }
 0x532   : > { %v2122_v63 = vpop.eup %2121  ;;  %1666 = vst [vmem:[%s348_s9] sm:$0xff] %v1664_v26 }
 0x533   : > { %v1877_v14 = vadd.f32 -1.0, %v2122_v63 }
 0x535   : > { %v1661_v25 = vmul.f32 1.6732632, %v1877_v14 }
 0x537   : > { %v1663_v47 = vsel %vm1651_vm11, %v1649_v22, %v1661_v25 }
 0x538   : > { %v1665_v44 = vmul.f32 1.050701, %v1663_v47 }
 0x53a   : > { %1667 = vst [vmem:[%s348_s9 + $0x8] sm:$0xff] %v1665_v44 }
 0x53b   : > { %2272 = shalt.err (!%p2269_p10)
}
 0x53c   : > { %s2329_s22 = smov 128   ;;  %s2330_s23 = smov 8  }
 0x53d   : > { %1911 = dma.vmem_to_hbm [thread:$0]  (%p2454_p7), %s1682_s1, 256, %s1684_s15, %s1669_s28, %s2329_s22, %s2329_s22, %s2330_s23  }
 0x53e PF: > { %s1698_s19 = sand.u32 1, %s2307_s24   ;;  %p3226_p12 = scmp.ge.s32.totalorder %s2319_s27, 2 }
 0x53f   : > { %s1699_s20 = scalar_lea.sflag [#allocation4], %s1698_s19 }
 0x540   : > { %p1928_p13 = pnand %p3226_p12, %p2406_p6 }
 0x542   : > { %p1929_p0 = pneg %p1928_p13 }
 0x544   : > { %2302 = dma.done.wait (%p1929_p0), %s1699_s20, 256  }
 0x545   : > { %2304 = vsyncadd (%p1929_p0), %s1699_s20, 4294967040  ;;  %p22_p3 = scmp.ge.s32.totalorder %s2438_s11, 4   ;;  %s3227_s24 = smov %s2311_s25 }
 0x546   : > { %s3228_s25 = smov %s2315_s26  ;;  %s3229_s26 = smov %s2450_s17 }
 0x547   : > { %s3230_s27 = smov %s2438_s11  ;;  %24 = sbr.rel (!%p22_p3) target bundleno = 9 (0x9), region = 105 }
 0x54c   :  { %1705 = vsyncpa [#allocation3], 1 }
 0x54d   :  { %1707 = vsyncpa [#allocation3 + $0x1], 1 }
 0x54e   :  { %1708 = vsyncpa [#allocation6], 1 }
 0x54f   :  { %1709 = vsyncpa [#allocation9], 1 }
 0x550   :  { %1710 = vsyncpa [#allocation4], 1 }
 0x551   :  { %1712 = vsyncpa [#allocation4 + $0x1], 1 }

</bundles_post_ra>
